<compile_context>
chip_gen: v7x
topology: tpu7x:2x2x1
jax: 0.10.0
libtpu: 0.0.40
codegen_flags: <defaults>
</compile_context>

<pallas_src>
import functools

import jax
import jax.numpy as jnp
from jax import lax
from jax.experimental import pallas as pl
from jax.experimental.pallas import tpu as pltpu


def _gate_math(gates, c_prev, H):
    """PyTorch LSTM gate math.  gates: (tB, 4H) pre-activation, order i,f,g,o."""
    i = jax.nn.sigmoid(gates[:, 0 * H:1 * H])
    f = jax.nn.sigmoid(gates[:, 1 * H:2 * H])
    g = jnp.tanh(gates[:, 2 * H:3 * H])
    o = jax.nn.sigmoid(gates[:, 3 * H:4 * H])
    c_new = f * c_prev + i * g
    h_new = o * jnp.tanh(c_new)
    return h_new, c_new


def autoencoder_kernel(x_ref,                        # (T*tB, F_in)
                       wih_e_ref, whh_e_ref, b_e_ref,    # encoder LSTM
                       wl1_ref, bl1_ref,                 # Linear(E -> L)
                       wl2_ref, bl2_ref,                 # Linear(L -> E)
                       wih_d_ref, whh_d_ref, b_d_ref,    # decoder LSTM
                       out_ref,                      # (T*tB, I)
                       xpe_ref,                      # scratch (T*tB, 4E)
                       ench_ref,                     # scratch (T*tB, E)
                       xpd_ref,                      # scratch (T*tB, 4I)
                       *, seq_len):
    T = seq_len
    TB, _ = x_ref.shape
    tB = TB // T
    E = whh_e_ref.shape[0]
    I = whh_d_ref.shape[0]
    unroll = True if T <= 32 else 8

    # ---- (1) batched encoder input projection: one well-shaped MXU matmul ----
    xpe_ref[...] = (jnp.dot(x_ref[...], wih_e_ref[...],
                            preferred_element_type=jnp.float32)
                    + b_e_ref[...])

    whh_e = whh_e_ref[...]

    # ---- (2) encoder recurrence: only h @ W_hh on the critical path ----
    def enc_step(t, carry):
        h, c = carry
        row = pl.multiple_of(t * tB, tB)
        gates = (xpe_ref[pl.ds(row, tB), :]
                 + jnp.dot(h, whh_e, preferred_element_type=jnp.float32))
        h, c = _gate_math(gates, c, E)
        ench_ref[pl.ds(row, tB), :] = h
        return (h, c)

    z_e = jnp.zeros((tB, E), jnp.float32)
    lax.fori_loop(0, T, enc_step, (z_e, z_e), unroll=unroll)

    # ---- (3) batched Linear(E->L), Linear(L->E) and decoder input projection ----
    lat = (jnp.dot(ench_ref[...], wl1_ref[...],
                   preferred_element_type=jnp.float32) + bl1_ref[...])
    dec_in = (jnp.dot(lat, wl2_ref[...],
                      preferred_element_type=jnp.float32) + bl2_ref[...])
    xpd_ref[...] = (jnp.dot(dec_in, wih_d_ref[...],
                            preferred_element_type=jnp.float32) + b_d_ref[...])

    whh_d = whh_d_ref[...]

    # ---- (4) decoder recurrence ----
    def dec_step(t, carry):
        h, c = carry
        row = pl.multiple_of(t * tB, tB)
        gates = (xpd_ref[pl.ds(row, tB), :]
                 + jnp.dot(h, whh_d, preferred_element_type=jnp.float32))
        h, c = _gate_math(gates, c, I)
        out_ref[pl.ds(row, tB), :] = h
        return (h, c)

    z_d = jnp.zeros((tB, I), jnp.float32)
    lax.fori_loop(0, T, dec_step, (z_d, z_d), unroll=unroll)


def _pick_batch_tile(B):
    """Batch tile: >=2 grid blocks when the batch allows it (megacore / pipelining)."""
    for tb in (128, 64, 32, 16, 8):
        if B % tb == 0 and B // tb >= 2:
            return tb
    return B


def init_params(key, input_size, embed_size, latent_size, time_feature_size):
    """Deterministic PyTorch-style uniform(-1/sqrt(H), 1/sqrt(H)) init."""
    f_in = input_size + time_feature_size
    ks = jax.random.split(key, 12)

    def u(k, shape, bound):
        return jax.random.uniform(k, shape, jnp.float32, -bound, bound)

    ke = 1.0 / jnp.sqrt(embed_size)
    kl = 1.0 / jnp.sqrt(embed_size)     # Linear(embed -> latent): 1/sqrt(fan_in=E)
    kl2 = 1.0 / jnp.sqrt(latent_size)   # Linear(latent -> embed)
    ki = 1.0 / jnp.sqrt(input_size)

    return dict(
        # encoder LSTM (input_size+time_feat -> embed)
        wih_e=u(ks[0], (4 * embed_size, f_in), ke),
        whh_e=u(ks[1], (4 * embed_size, embed_size), ke),
        bih_e=u(ks[2], (4 * embed_size,), ke),
        bhh_e=u(ks[3], (4 * embed_size,), ke),
        # Linear(embed -> latent)
        wl1=u(ks[4], (latent_size, embed_size), kl),
        bl1=u(ks[5], (latent_size,), kl),
        # Linear(latent -> embed)
        wl2=u(ks[6], (embed_size, latent_size), kl2),
        bl2=u(ks[7], (embed_size,), kl2),
        # decoder LSTM (embed -> input_size)
        wih_d=u(ks[8], (4 * input_size, embed_size), ki),
        whh_d=u(ks[9], (4 * input_size, input_size), ki),
        bih_d=u(ks[10], (4 * input_size,), ki),
        bhh_d=u(ks[11], (4 * input_size,), ki),
    )


@jax.jit
def timeseries_autoencoder(x, params):
    """x: (B, T, input_size + time_feature_size) float32 -> (B, T, input_size)."""
    B, T, F_in = x.shape
    E = params["whh_e"].shape[1]
    I = params["whh_d"].shape[1]

    tB = _pick_batch_tile(B)
    NB = B // tB

    # (B, T, F) -> (NB, T*tB, F): time-major inside each batch block so that
    # timestep t of a block is the contiguous row range [t*tB, (t+1)*tB).
    x_blk = (x.astype(jnp.float32)
             .reshape(NB, tB, T, F_in)
             .transpose(0, 2, 1, 3)
             .reshape(NB, T * tB, F_in))

    # Pre-transpose weights so the kernel does plain (rows, F) @ (F, 4H) matmuls,
    # and fold b_ih + b_hh (PyTorch adds both).
    wih_e_t = params["wih_e"].T                              # (F, 4E)
    whh_e_t = params["whh_e"].T                              # (E, 4E)
    b_e = (params["bih_e"] + params["bhh_e"]).reshape(1, -1)
    wl1_t = params["wl1"].T                                  # (E, L)
    bl1 = params["bl1"].reshape(1, -1)
    wl2_t = params["wl2"].T                                  # (L, E)
    bl2 = params["bl2"].reshape(1, -1)
    wih_d_t = params["wih_d"].T                              # (E, 4I)
    whh_d_t = params["whh_d"].T                              # (I, 4I)
    b_d = (params["bih_d"] + params["bhh_d"]).reshape(1, -1)

    weights = (wih_e_t, whh_e_t, b_e, wl1_t, bl1, wl2_t, bl2,
               wih_d_t, whh_d_t, b_d)

    def w_spec(w):
        nd = w.ndim
        return pl.BlockSpec(w.shape, lambda b, _nd=nd: (0,) * _nd)

    grid_spec = pltpu.PrefetchScalarGridSpec(
        num_scalar_prefetch=0,
        grid=(NB,),
        in_specs=[pl.BlockSpec((None, T * tB, F_in), lambda b: (b, 0, 0))]
        + [w_spec(w) for w in weights],
        out_specs=pl.BlockSpec((None, T * tB, I), lambda b: (b, 0, 0)),
        scratch_shapes=[
            pltpu.VMEM((T * tB, 4 * E), jnp.float32),   # encoder x-projection
            pltpu.VMEM((T * tB, E), jnp.float32),       # encoder hidden sequence
            pltpu.VMEM((T * tB, 4 * I), jnp.float32),   # decoder x-projection
        ],
    )

    out_blk = pl.pallas_call(
        functools.partial(autoencoder_kernel, seq_len=T),
        out_shape=jax.ShapeDtypeStruct((NB, T * tB, I), jnp.float32),
        grid_spec=grid_spec,
        compiler_params=pltpu.CompilerParams(
            dimension_semantics=("parallel",),
            vmem_limit_bytes=32 * 1024 * 1024,
        ),
    )(x_blk, *weights)

    # (NB, T*tB, I) -> (B, T, I)
    return (out_blk.reshape(NB, T, tB, I)
            .transpose(0, 2, 1, 3)
            .reshape(B, T, I))


# ---------------- pure-JAX reference (for correctness check) ----------------
def _lstm_ref(x, wih, whh, bih, bhh, H):
    B = x.shape[0]

    def step(carry, xt):
        h, c = carry
        g = xt @ wih.T + bih + h @ whh.T + bhh
        i = jax.nn.sigmoid(g[:, 0 * H:1 * H])
        f = jax.nn.sigmoid(g[:, 1 * H:2 * H])
        gg = jnp.tanh(g[:, 2 * H:3 * H])
        o = jax.nn.sigmoid(g[:, 3 * H:4 * H])
        c = f * c + i * gg
        h = o * jnp.tanh(c)
        return (h, c), h

    h0 = jnp.zeros((B, H), jnp.float32)
    _, ys = lax.scan(step, (h0, h0), jnp.transpose(x, (1, 0, 2)))
    return jnp.transpose(ys, (1, 0, 2))


def reference(x, p):
    E = p["whh_e"].shape[1]
    I = p["whh_d"].shape[1]
    enc = _lstm_ref(x, p["wih_e"], p["whh_e"], p["bih_e"], p["bhh_e"], E)
    lat = enc @ p["wl1"].T + p["bl1"]
    dec_in = lat @ p["wl2"].T + p["bl2"]
    return _lstm_ref(dec_in, p["wih_d"], p["whh_d"], p["bih_d"], p["bhh_d"], I)


if __name__ == "__main__":
    # Small, forward-consistent shapes.
    input_size = 8
    time_feature_size = 4
    embed_size = 16
    latent_size = 8
    B, T = 2, 8

    key = jax.random.PRNGKey(0)
    kx, kp = jax.random.split(key)
    x = jax.random.normal(kx, (B, T, input_size + time_feature_size), jnp.float32)
    params = init_params(kp, input_size, embed_size, latent_size, time_feature_size)

    out = timeseries_autoencoder(x, params)
    out = jax.block_until_ready(out)

    ref = reference(x, params)
    assert out.shape == (B, T, input_size), out.shape
    assert jnp.allclose(out, ref, rtol=1e-5, atol=1e-5), float(jnp.max(jnp.abs(out - ref)))

    # TODO(synk): for v6e/v7x at realistic sizes, cast weights/activations to bf16
    # (keep f32 accumulation) once the parity tolerance is relaxed.
    print("KERNEL_OK")
</pallas_src>

<mosaic_0001>
module attributes {stable_mosaic.version = 11 : i64} {
  func.func @autoencoder_kernel(%arg0: i32, %arg1: memref<1x16x12xf32, #tpu.memory_space<vmem>>, %arg2: memref<12x64xf32, #tpu.memory_space<vmem>>, %arg3: memref<16x64xf32, #tpu.memory_space<vmem>>, %arg4: memref<1x64xf32, #tpu.memory_space<vmem>>, %arg5: memref<16x8xf32, #tpu.memory_space<vmem>>, %arg6: memref<1x8xf32, #tpu.memory_space<vmem>>, %arg7: memref<8x16xf32, #tpu.memory_space<vmem>>, %arg8: memref<1x16xf32, #tpu.memory_space<vmem>>, %arg9: memref<16x32xf32, #tpu.memory_space<vmem>>, %arg10: memref<8x32xf32, #tpu.memory_space<vmem>>, %arg11: memref<1x32xf32, #tpu.memory_space<vmem>>, %arg12: memref<1x16x8xf32, #tpu.memory_space<vmem>>, %arg13: memref<16x64xf32, #tpu.memory_space<vmem>>, %arg14: memref<16x16xf32, #tpu.memory_space<vmem>>, %arg15: memref<16x32xf32, #tpu.memory_space<vmem>>) attributes {dimension_semantics = [#tpu.dimension_semantics<parallel>], iteration_bounds = array<i64: 1>, scalar_prefetch = 0 : i64, scratch_operands = 3 : i64, tpu.core_type = #tpu.core_type<tc>, window_params = [{transform_indices = @transform_0, window_bounds = array<i64: 1, 16, 12>}, {pipeline_mode = #tpu.pipeline_mode<synchronous>, transform_indices = @transform_1, window_bounds = array<i64: 12, 64>}, {pipeline_mode = #tpu.pipeline_mode<synchronous>, transform_indices = @transform_2, window_bounds = array<i64: 16, 64>}, {pipeline_mode = #tpu.pipeline_mode<synchronous>, transform_indices = @transform_3, window_bounds = array<i64: 1, 64>}, {pipeline_mode = #tpu.pipeline_mode<synchronous>, transform_indices = @transform_4, window_bounds = array<i64: 16, 8>}, {pipeline_mode = #tpu.pipeline_mode<synchronous>, transform_indices = @transform_5, window_bounds = array<i64: 1, 8>}, {pipeline_mode = #tpu.pipeline_mode<synchronous>, transform_indices = @transform_6, window_bounds = array<i64: 8, 16>}, {pipeline_mode = #tpu.pipeline_mode<synchronous>, transform_indices = @transform_7, window_bounds = array<i64: 1, 16>}, {pipeline_mode = #tpu.pipeline_mode<synchronous>, transform_indices = @transform_8, window_bounds = array<i64: 16, 32>}, {pipeline_mode = #tpu.pipeline_mode<synchronous>, transform_indices = @transform_9, window_bounds = array<i64: 8, 32>}, {pipeline_mode = #tpu.pipeline_mode<synchronous>, transform_indices = @transform_10, window_bounds = array<i64: 1, 32>}, {transform_indices = @transform_11, window_bounds = array<i64: 1, 16, 8>}]} {
    %c0 = arith.constant 0 : index
    %c0_0 = arith.constant 0 : index
    %c0_1 = arith.constant 0 : index
    %0 = vector.load %arg1[%c0, %c0_0, %c0_1] : memref<1x16x12xf32, #tpu.memory_space<vmem>>, vector<1x16x12xf32>
    %1 = vector.shape_cast %0 : vector<1x16x12xf32> to vector<16x12xf32>
    %c0_2 = arith.constant 0 : index
    %c0_3 = arith.constant 0 : index
    %2 = vector.load %arg2[%c0_2, %c0_3] : memref<12x64xf32, #tpu.memory_space<vmem>>, vector<12x64xf32>
    %cst = arith.constant dense<0.000000e+00> : vector<16x64xf32>
    %3 = tpu.matmul %1, %2, %cst {dimension_numbers = #tpu.dot_dimension_numbers<[1], [0], [0], [1], [0, 0, 1, 1], [], []>} : vector<16x12xf32>, vector<12x64xf32>, vector<16x64xf32> -> vector<16x64xf32>
    %c0_4 = arith.constant 0 : index
    %c0_5 = arith.constant 0 : index
    %4 = vector.load %arg4[%c0_4, %c0_5] : memref<1x64xf32, #tpu.memory_space<vmem>>, vector<1x64xf32>
    %5 = vector.broadcast %4 : vector<1x64xf32> to vector<16x64xf32>
    %6 = arith.addf %3, %5 : vector<16x64xf32>
    %c0_6 = arith.constant 0 : index
    %c0_7 = arith.constant 0 : index
    %7 = vector.load %arg13[%c0_6, %c0_7] : memref<16x64xf32, #tpu.memory_space<vmem>>, vector<16x64xf32>
    tpu.vector_store %arg13[%c0_6, %c0_7], %6 {strides = array<i32>} : memref<16x64xf32, #tpu.memory_space<vmem>>, vector<16x64xf32>,
    %c0_8 = arith.constant 0 : index
    %c0_9 = arith.constant 0 : index
    %8 = vector.load %arg3[%c0_8, %c0_9] : memref<16x64xf32, #tpu.memory_space<vmem>>, vector<16x64xf32>
    %cst_10 = arith.constant 0.000000e+00 : f32
    %9 = vector.broadcast %cst_10 : f32 to vector<2x16xf32>
    %c0_i32 = arith.constant 0 : i32
    %c2_i32 = arith.constant 2 : i32
    %10 = arith.muli %c0_i32, %c2_i32 : i32
    %11 = tpu.assume_multiple %10, 2 : i32
    %12 = arith.index_cast %11 : i32 to index
    %c0_11 = arith.constant 0 : index
    %13 = vector.load %arg13[%12, %c0_11] : memref<16x64xf32, #tpu.memory_space<vmem>>, vector<2x64xf32>
    %cst_12 = arith.constant dense<0.000000e+00> : vector<2x64xf32>
    %14 = tpu.matmul %9, %8, %cst_12 {dimension_numbers = #tpu.dot_dimension_numbers<[1], [0], [0], [1], [0, 0, 1, 1], [], []>} : vector<2x16xf32>, vector<16x64xf32>, vector<2x64xf32> -> vector<2x64xf32>
    %15 = arith.addf %13, %14 : vector<2x64xf32>
    %16 = vector.extract_strided_slice %15 {offsets = [0, 0], sizes = [2, 16], strides = [1, 1]} : vector<2x64xf32> to vector<2x16xf32>
    %17 = arith.negf %16 : vector<2x16xf32>
    %18 = math.exp %17 : vector<2x16xf32>
    %cst_13 = arith.constant 1.000000e+00 : f32
    %19 = vector.broadcast %cst_13 : f32 to vector<2x16xf32>
    %20 = arith.addf %19, %18 : vector<2x16xf32>
    %21 = arith.divf %19, %20 : vector<2x16xf32>
    %22 = vector.extract_strided_slice %15 {offsets = [0, 16], sizes = [2, 16], strides = [1, 1]} : vector<2x64xf32> to vector<2x16xf32>
    %23 = arith.negf %22 : vector<2x16xf32>
    %24 = math.exp %23 : vector<2x16xf32>
    %cst_14 = arith.constant 1.000000e+00 : f32
    %25 = vector.broadcast %cst_14 : f32 to vector<2x16xf32>
    %26 = arith.addf %25, %24 : vector<2x16xf32>
    %27 = arith.divf %25, %26 : vector<2x16xf32>
    %28 = vector.extract_strided_slice %15 {offsets = [0, 32], sizes = [2, 16], strides = [1, 1]} : vector<2x64xf32> to vector<2x16xf32>
    %29 = math.tanh %28 : vector<2x16xf32>
    %30 = vector.extract_strided_slice %15 {offsets = [0, 48], sizes = [2, 16], strides = [1, 1]} : vector<2x64xf32> to vector<2x16xf32>
    %31 = arith.negf %30 : vector<2x16xf32>
    %32 = math.exp %31 : vector<2x16xf32>
    %cst_15 = arith.constant 1.000000e+00 : f32
    %33 = vector.broadcast %cst_15 : f32 to vector<2x16xf32>
    %34 = arith.addf %33, %32 : vector<2x16xf32>
    %35 = arith.divf %33, %34 : vector<2x16xf32>
    %36 = arith.mulf %27, %9 : vector<2x16xf32>
    %37 = arith.mulf %21, %29 : vector<2x16xf32>
    %38 = arith.addf %36, %37 : vector<2x16xf32>
    %39 = math.tanh %38 : vector<2x16xf32>
    %40 = arith.mulf %35, %39 : vector<2x16xf32>
    %41 = arith.index_cast %11 : i32 to index
    %c0_16 = arith.constant 0 : index
    %42 = vector.load %arg14[%41, %c0_16] : memref<16x16xf32, #tpu.memory_space<vmem>>, vector<2x16xf32>
    tpu.vector_store %arg14[%41, %c0_16], %40 {strides = array<i32>} : memref<16x16xf32, #tpu.memory_space<vmem>>, vector<2x16xf32>,
    %c1_i32 = arith.constant 1 : i32
    %c2_i32_17 = arith.constant 2 : i32
    %43 = arith.muli %c1_i32, %c2_i32_17 : i32
    %44 = tpu.assume_multiple %43, 2 : i32
    %45 = arith.index_cast %44 : i32 to index
    %c0_18 = arith.constant 0 : index
    %46 = vector.load %arg13[%45, %c0_18] : memref<16x64xf32, #tpu.memory_space<vmem>>, vector<2x64xf32>
    %cst_19 = arith.constant dense<0.000000e+00> : vector<2x64xf32>
    %47 = tpu.matmul %40, %8, %cst_19 {dimension_numbers = #tpu.dot_dimension_numbers<[1], [0], [0], [1], [0, 0, 1, 1], [], []>} : vector<2x16xf32>, vector<16x64xf32>, vector<2x64xf32> -> vector<2x64xf32>
    %48 = arith.addf %46, %47 : vector<2x64xf32>
    %49 = vector.extract_strided_slice %48 {offsets = [0, 0], sizes = [2, 16], strides = [1, 1]} : vector<2x64xf32> to vector<2x16xf32>
    %50 = arith.negf %49 : vector<2x16xf32>
    %51 = math.exp %50 : vector<2x16xf32>
    %cst_20 = arith.constant 1.000000e+00 : f32
    %52 = vector.broadcast %cst_20 : f32 to vector<2x16xf32>
    %53 = arith.addf %52, %51 : vector<2x16xf32>
    %54 = arith.divf %52, %53 : vector<2x16xf32>
    %55 = vector.extract_strided_slice %48 {offsets = [0, 16], sizes = [2, 16], strides = [1, 1]} : vector<2x64xf32> to vector<2x16xf32>
    %56 = arith.negf %55 : vector<2x16xf32>
    %57 = math.exp %56 : vector<2x16xf32>
    %cst_21 = arith.constant 1.000000e+00 : f32
    %58 = vector.broadcast %cst_21 : f32 to vector<2x16xf32>
    %59 = arith.addf %58, %57 : vector<2x16xf32>
    %60 = arith.divf %58, %59 : vector<2x16xf32>
    %61 = vector.extract_strided_slice %48 {offsets = [0, 32], sizes = [2, 16], strides = [1, 1]} : vector<2x64xf32> to vector<2x16xf32>
    %62 = math.tanh %61 : vector<2x16xf32>
    %63 = vector.extract_strided_slice %48 {offsets = [0, 48], sizes = [2, 16], strides = [1, 1]} : vector<2x64xf32> to vector<2x16xf32>
    %64 = arith.negf %63 : vector<2x16xf32>
    %65 = math.exp %64 : vector<2x16xf32>
    %cst_22 = arith.constant 1.000000e+00 : f32
    %66 = vector.broadcast %cst_22 : f32 to vector<2x16xf32>
    %67 = arith.addf %66, %65 : vector<2x16xf32>
    %68 = arith.divf %66, %67 : vector<2x16xf32>
    %69 = arith.mulf %60, %38 : vector<2x16xf32>
    %70 = arith.mulf %54, %62 : vector<2x16xf32>
    %71 = arith.addf %69, %70 : vector<2x16xf32>
    %72 = math.tanh %71 : vector<2x16xf32>
    %73 = arith.mulf %68, %72 : vector<2x16xf32>
    %74 = arith.index_cast %44 : i32 to index
    %c0_23 = arith.constant 0 : index
    %75 = vector.load %arg14[%74, %c0_23] : memref<16x16xf32, #tpu.memory_space<vmem>>, vector<2x16xf32>
    tpu.vector_store %arg14[%74, %c0_23], %73 {strides = array<i32>} : memref<16x16xf32, #tpu.memory_space<vmem>>, vector<2x16xf32>,
    %c2_i32_24 = arith.constant 2 : i32
    %c2_i32_25 = arith.constant 2 : i32
    %76 = arith.muli %c2_i32_24, %c2_i32_25 : i32
    %77 = tpu.assume_multiple %76, 2 : i32
    %78 = arith.index_cast %77 : i32 to index
    %c0_26 = arith.constant 0 : index
    %79 = vector.load %arg13[%78, %c0_26] : memref<16x64xf32, #tpu.memory_space<vmem>>, vector<2x64xf32>
    %cst_27 = arith.constant dense<0.000000e+00> : vector<2x64xf32>
    %80 = tpu.matmul %73, %8, %cst_27 {dimension_numbers = #tpu.dot_dimension_numbers<[1], [0], [0], [1], [0, 0, 1, 1], [], []>} : vector<2x16xf32>, vector<16x64xf32>, vector<2x64xf32> -> vector<2x64xf32>
    %81 = arith.addf %79, %80 : vector<2x64xf32>
    %82 = vector.extract_strided_slice %81 {offsets = [0, 0], sizes = [2, 16], strides = [1, 1]} : vector<2x64xf32> to vector<2x16xf32>
    %83 = arith.negf %82 : vector<2x16xf32>
    %84 = math.exp %83 : vector<2x16xf32>
    %cst_28 = arith.constant 1.000000e+00 : f32
    %85 = vector.broadcast %cst_28 : f32 to vector<2x16xf32>
    %86 = arith.addf %85, %84 : vector<2x16xf32>
    %87 = arith.divf %85, %86 : vector<2x16xf32>
    %88 = vector.extract_strided_slice %81 {offsets = [0, 16], sizes = [2, 16], strides = [1, 1]} : vector<2x64xf32> to vector<2x16xf32>
    %89 = arith.negf %88 : vector<2x16xf32>
    %90 = math.exp %89 : vector<2x16xf32>
    %cst_29 = arith.constant 1.000000e+00 : f32
    %91 = vector.broadcast %cst_29 : f32 to vector<2x16xf32>
    %92 = arith.addf %91, %90 : vector<2x16xf32>
    %93 = arith.divf %91, %92 : vector<2x16xf32>
    %94 = vector.extract_strided_slice %81 {offsets = [0, 32], sizes = [2, 16], strides = [1, 1]} : vector<2x64xf32> to vector<2x16xf32>
    %95 = math.tanh %94 : vector<2x16xf32>
    %96 = vector.extract_strided_slice %81 {offsets = [0, 48], sizes = [2, 16], strides = [1, 1]} : vector<2x64xf32> to vector<2x16xf32>
    %97 = arith.negf %96 : vector<2x16xf32>
    %98 = math.exp %97 : vector<2x16xf32>
    %cst_30 = arith.constant 1.000000e+00 : f32
    %99 = vector.broadcast %cst_30 : f32 to vector<2x16xf32>
    %100 = arith.addf %99, %98 : vector<2x16xf32>
    %101 = arith.divf %99, %100 : vector<2x16xf32>
    %102 = arith.mulf %93, %71 : vector<2x16xf32>
    %103 = arith.mulf %87, %95 : vector<2x16xf32>
    %104 = arith.addf %102, %103 : vector<2x16xf32>
    %105 = math.tanh %104 : vector<2x16xf32>
    %106 = arith.mulf %101, %105 : vector<2x16xf32>
    %107 = arith.index_cast %77 : i32 to index
    %c0_31 = arith.constant 0 : index
    %108 = vector.load %arg14[%107, %c0_31] : memref<16x16xf32, #tpu.memory_space<vmem>>, vector<2x16xf32>
    tpu.vector_store %arg14[%107, %c0_31], %106 {strides = array<i32>} : memref<16x16xf32, #tpu.memory_space<vmem>>, vector<2x16xf32>,
    %c3_i32 = arith.constant 3 : i32
    %c2_i32_32 = arith.constant 2 : i32
    %109 = arith.muli %c3_i32, %c2_i32_32 : i32
    %110 = tpu.assume_multiple %109, 2 : i32
    %111 = arith.index_cast %110 : i32 to index
    %c0_33 = arith.constant 0 : index
    %112 = vector.load %arg13[%111, %c0_33] : memref<16x64xf32, #tpu.memory_space<vmem>>, vector<2x64xf32>
    %cst_34 = arith.constant dense<0.000000e+00> : vector<2x64xf32>
    %113 = tpu.matmul %106, %8, %cst_34 {dimension_numbers = #tpu.dot_dimension_numbers<[1], [0], [0], [1], [0, 0, 1, 1], [], []>} : vector<2x16xf32>, vector<16x64xf32>, vector<2x64xf32> -> vector<2x64xf32>
    %114 = arith.addf %112, %113 : vector<2x64xf32>
    %115 = vector.extract_strided_slice %114 {offsets = [0, 0], sizes = [2, 16], strides = [1, 1]} : vector<2x64xf32> to vector<2x16xf32>
    %116 = arith.negf %115 : vector<2x16xf32>
    %117 = math.exp %116 : vector<2x16xf32>
    %cst_35 = arith.constant 1.000000e+00 : f32
    %118 = vector.broadcast %cst_35 : f32 to vector<2x16xf32>
    %119 = arith.addf %118, %117 : vector<2x16xf32>
    %120 = arith.divf %118, %119 : vector<2x16xf32>
    %121 = vector.extract_strided_slice %114 {offsets = [0, 16], sizes = [2, 16], strides = [1, 1]} : vector<2x64xf32> to vector<2x16xf32>
    %122 = arith.negf %121 : vector<2x16xf32>
    %123 = math.exp %122 : vector<2x16xf32>
    %cst_36 = arith.constant 1.000000e+00 : f32
    %124 = vector.broadcast %cst_36 : f32 to vector<2x16xf32>
    %125 = arith.addf %124, %123 : vector<2x16xf32>
    %126 = arith.divf %124, %125 : vector<2x16xf32>
    %127 = vector.extract_strided_slice %114 {offsets = [0, 32], sizes = [2, 16], strides = [1, 1]} : vector<2x64xf32> to vector<2x16xf32>
    %128 = math.tanh %127 : vector<2x16xf32>
    %129 = vector.extract_strided_slice %114 {offsets = [0, 48], sizes = [2, 16], strides = [1, 1]} : vector<2x64xf32> to vector<2x16xf32>
    %130 = arith.negf %129 : vector<2x16xf32>
    %131 = math.exp %130 : vector<2x16xf32>
    %cst_37 = arith.constant 1.000000e+00 : f32
    %132 = vector.broadcast %cst_37 : f32 to vector<2x16xf32>
    %133 = arith.addf %132, %131 : vector<2x16xf32>
    %134 = arith.divf %132, %133 : vector<2x16xf32>
    %135 = arith.mulf %126, %104 : vector<2x16xf32>
    %136 = arith.mulf %120, %128 : vector<2x16xf32>
    %137 = arith.addf %135, %136 : vector<2x16xf32>
    %138 = math.tanh %137 : vector<2x16xf32>
    %139 = arith.mulf %134, %138 : vector<2x16xf32>
    %140 = arith.index_cast %110 : i32 to index
    %c0_38 = arith.constant 0 : index
    %141 = vector.load %arg14[%140, %c0_38] : memref<16x16xf32, #tpu.memory_space<vmem>>, vector<2x16xf32>
    tpu.vector_store %arg14[%140, %c0_38], %139 {strides = array<i32>} : memref<16x16xf32, #tpu.memory_space<vmem>>, vector<2x16xf32>,
    %c4_i32 = arith.constant 4 : i32
    %c2_i32_39 = arith.constant 2 : i32
    %142 = arith.muli %c4_i32, %c2_i32_39 : i32
    %143 = tpu.assume_multiple %142, 2 : i32
    %144 = arith.index_cast %143 : i32 to index
    %c0_40 = arith.constant 0 : index
    %145 = vector.load %arg13[%144, %c0_40] : memref<16x64xf32, #tpu.memory_space<vmem>>, vector<2x64xf32>
    %cst_41 = arith.constant dense<0.000000e+00> : vector<2x64xf32>
    %146 = tpu.matmul %139, %8, %cst_41 {dimension_numbers = #tpu.dot_dimension_numbers<[1], [0], [0], [1], [0, 0, 1, 1], [], []>} : vector<2x16xf32>, vector<16x64xf32>, vector<2x64xf32> -> vector<2x64xf32>
    %147 = arith.addf %145, %146 : vector<2x64xf32>
    %148 = vector.extract_strided_slice %147 {offsets = [0, 0], sizes = [2, 16], strides = [1, 1]} : vector<2x64xf32> to vector<2x16xf32>
    %149 = arith.negf %148 : vector<2x16xf32>
    %150 = math.exp %149 : vector<2x16xf32>
    %cst_42 = arith.constant 1.000000e+00 : f32
    %151 = vector.broadcast %cst_42 : f32 to vector<2x16xf32>
    %152 = arith.addf %151, %150 : vector<2x16xf32>
    %153 = arith.divf %151, %152 : vector<2x16xf32>
    %154 = vector.extract_strided_slice %147 {offsets = [0, 16], sizes = [2, 16], strides = [1, 1]} : vector<2x64xf32> to vector<2x16xf32>
    %155 = arith.negf %154 : vector<2x16xf32>
    %156 = math.exp %155 : vector<2x16xf32>
    %cst_43 = arith.constant 1.000000e+00 : f32
    %157 = vector.broadcast %cst_43 : f32 to vector<2x16xf32>
    %158 = arith.addf %157, %156 : vector<2x16xf32>
    %159 = arith.divf %157, %158 : vector<2x16xf32>
    %160 = vector.extract_strided_slice %147 {offsets = [0, 32], sizes = [2, 16], strides = [1, 1]} : vector<2x64xf32> to vector<2x16xf32>
    %161 = math.tanh %160 : vector<2x16xf32>
    %162 = vector.extract_strided_slice %147 {offsets = [0, 48], sizes = [2, 16], strides = [1, 1]} : vector<2x64xf32> to vector<2x16xf32>
    %163 = arith.negf %162 : vector<2x16xf32>
    %164 = math.exp %163 : vector<2x16xf32>
    %cst_44 = arith.constant 1.000000e+00 : f32
    %165 = vector.broadcast %cst_44 : f32 to vector<2x16xf32>
    %166 = arith.addf %165, %164 : vector<2x16xf32>
    %167 = arith.divf %165, %166 : vector<2x16xf32>
    %168 = arith.mulf %159, %137 : vector<2x16xf32>
    %169 = arith.mulf %153, %161 : vector<2x16xf32>
    %170 = arith.addf %168, %169 : vector<2x16xf32>
    %171 = math.tanh %170 : vector<2x16xf32>
    %172 = arith.mulf %167, %171 : vector<2x16xf32>
    %173 = arith.index_cast %143 : i32 to index
    %c0_45 = arith.constant 0 : index
    %174 = vector.load %arg14[%173, %c0_45] : memref<16x16xf32, #tpu.memory_space<vmem>>, vector<2x16xf32>
    tpu.vector_store %arg14[%173, %c0_45], %172 {strides = array<i32>} : memref<16x16xf32, #tpu.memory_space<vmem>>, vector<2x16xf32>,
    %c5_i32 = arith.constant 5 : i32
    %c2_i32_46 = arith.constant 2 : i32
    %175 = arith.muli %c5_i32, %c2_i32_46 : i32
    %176 = tpu.assume_multiple %175, 2 : i32
    %177 = arith.index_cast %176 : i32 to index
    %c0_47 = arith.constant 0 : index
    %178 = vector.load %arg13[%177, %c0_47] : memref<16x64xf32, #tpu.memory_space<vmem>>, vector<2x64xf32>
    %cst_48 = arith.constant dense<0.000000e+00> : vector<2x64xf32>
    %179 = tpu.matmul %172, %8, %cst_48 {dimension_numbers = #tpu.dot_dimension_numbers<[1], [0], [0], [1], [0, 0, 1, 1], [], []>} : vector<2x16xf32>, vector<16x64xf32>, vector<2x64xf32> -> vector<2x64xf32>
    %180 = arith.addf %178, %179 : vector<2x64xf32>
    %181 = vector.extract_strided_slice %180 {offsets = [0, 0], sizes = [2, 16], strides = [1, 1]} : vector<2x64xf32> to vector<2x16xf32>
    %182 = arith.negf %181 : vector<2x16xf32>
    %183 = math.exp %182 : vector<2x16xf32>
    %cst_49 = arith.constant 1.000000e+00 : f32
    %184 = vector.broadcast %cst_49 : f32 to vector<2x16xf32>
    %185 = arith.addf %184, %183 : vector<2x16xf32>
    %186 = arith.divf %184, %185 : vector<2x16xf32>
    %187 = vector.extract_strided_slice %180 {offsets = [0, 16], sizes = [2, 16], strides = [1, 1]} : vector<2x64xf32> to vector<2x16xf32>
    %188 = arith.negf %187 : vector<2x16xf32>
    %189 = math.exp %188 : vector<2x16xf32>
    %cst_50 = arith.constant 1.000000e+00 : f32
    %190 = vector.broadcast %cst_50 : f32 to vector<2x16xf32>
    %191 = arith.addf %190, %189 : vector<2x16xf32>
    %192 = arith.divf %190, %191 : vector<2x16xf32>
    %193 = vector.extract_strided_slice %180 {offsets = [0, 32], sizes = [2, 16], strides = [1, 1]} : vector<2x64xf32> to vector<2x16xf32>
    %194 = math.tanh %193 : vector<2x16xf32>
    %195 = vector.extract_strided_slice %180 {offsets = [0, 48], sizes = [2, 16], strides = [1, 1]} : vector<2x64xf32> to vector<2x16xf32>
    %196 = arith.negf %195 : vector<2x16xf32>
    %197 = math.exp %196 : vector<2x16xf32>
    %cst_51 = arith.constant 1.000000e+00 : f32
    %198 = vector.broadcast %cst_51 : f32 to vector<2x16xf32>
    %199 = arith.addf %198, %197 : vector<2x16xf32>
    %200 = arith.divf %198, %199 : vector<2x16xf32>
    %201 = arith.mulf %192, %170 : vector<2x16xf32>
    %202 = arith.mulf %186, %194 : vector<2x16xf32>
    %203 = arith.addf %201, %202 : vector<2x16xf32>
    %204 = math.tanh %203 : vector<2x16xf32>
    %205 = arith.mulf %200, %204 : vector<2x16xf32>
    %206 = arith.index_cast %176 : i32 to index
    %c0_52 = arith.constant 0 : index
    %207 = vector.load %arg14[%206, %c0_52] : memref<16x16xf32, #tpu.memory_space<vmem>>, vector<2x16xf32>
    tpu.vector_store %arg14[%206, %c0_52], %205 {strides = array<i32>} : memref<16x16xf32, #tpu.memory_space<vmem>>, vector<2x16xf32>,
    %c6_i32 = arith.constant 6 : i32
    %c2_i32_53 = arith.constant 2 : i32
    %208 = arith.muli %c6_i32, %c2_i32_53 : i32
    %209 = tpu.assume_multiple %208, 2 : i32
    %210 = arith.index_cast %209 : i32 to index
    %c0_54 = arith.constant 0 : index
    %211 = vector.load %arg13[%210, %c0_54] : memref<16x64xf32, #tpu.memory_space<vmem>>, vector<2x64xf32>
    %cst_55 = arith.constant dense<0.000000e+00> : vector<2x64xf32>
    %212 = tpu.matmul %205, %8, %cst_55 {dimension_numbers = #tpu.dot_dimension_numbers<[1], [0], [0], [1], [0, 0, 1, 1], [], []>} : vector<2x16xf32>, vector<16x64xf32>, vector<2x64xf32> -> vector<2x64xf32>
    %213 = arith.addf %211, %212 : vector<2x64xf32>
    %214 = vector.extract_strided_slice %213 {offsets = [0, 0], sizes = [2, 16], strides = [1, 1]} : vector<2x64xf32> to vector<2x16xf32>
    %215 = arith.negf %214 : vector<2x16xf32>
    %216 = math.exp %215 : vector<2x16xf32>
    %cst_56 = arith.constant 1.000000e+00 : f32
    %217 = vector.broadcast %cst_56 : f32 to vector<2x16xf32>
    %218 = arith.addf %217, %216 : vector<2x16xf32>
    %219 = arith.divf %217, %218 : vector<2x16xf32>
    %220 = vector.extract_strided_slice %213 {offsets = [0, 16], sizes = [2, 16], strides = [1, 1]} : vector<2x64xf32> to vector<2x16xf32>
    %221 = arith.negf %220 : vector<2x16xf32>
    %222 = math.exp %221 : vector<2x16xf32>
    %cst_57 = arith.constant 1.000000e+00 : f32
    %223 = vector.broadcast %cst_57 : f32 to vector<2x16xf32>
    %224 = arith.addf %223, %222 : vector<2x16xf32>
    %225 = arith.divf %223, %224 : vector<2x16xf32>
    %226 = vector.extract_strided_slice %213 {offsets = [0, 32], sizes = [2, 16], strides = [1, 1]} : vector<2x64xf32> to vector<2x16xf32>
    %227 = math.tanh %226 : vector<2x16xf32>
    %228 = vector.extract_strided_slice %213 {offsets = [0, 48], sizes = [2, 16], strides = [1, 1]} : vector<2x64xf32> to vector<2x16xf32>
    %229 = arith.negf %228 : vector<2x16xf32>
    %230 = math.exp %229 : vector<2x16xf32>
    %cst_58 = arith.constant 1.000000e+00 : f32
    %231 = vector.broadcast %cst_58 : f32 to vector<2x16xf32>
    %232 = arith.addf %231, %230 : vector<2x16xf32>
    %233 = arith.divf %231, %232 : vector<2x16xf32>
    %234 = arith.mulf %225, %203 : vector<2x16xf32>
    %235 = arith.mulf %219, %227 : vector<2x16xf32>
    %236 = arith.addf %234, %235 : vector<2x16xf32>
    %237 = math.tanh %236 : vector<2x16xf32>
    %238 = arith.mulf %233, %237 : vector<2x16xf32>
    %239 = arith.index_cast %209 : i32 to index
    %c0_59 = arith.constant 0 : index
    %240 = vector.load %arg14[%239, %c0_59] : memref<16x16xf32, #tpu.memory_space<vmem>>, vector<2x16xf32>
    tpu.vector_store %arg14[%239, %c0_59], %238 {strides = array<i32>} : memref<16x16xf32, #tpu.memory_space<vmem>>, vector<2x16xf32>,
    %c7_i32 = arith.constant 7 : i32
    %c2_i32_60 = arith.constant 2 : i32
    %241 = arith.muli %c7_i32, %c2_i32_60 : i32
    %242 = tpu.assume_multiple %241, 2 : i32
    %243 = arith.index_cast %242 : i32 to index
    %c0_61 = arith.constant 0 : index
    %244 = vector.load %arg13[%243, %c0_61] : memref<16x64xf32, #tpu.memory_space<vmem>>, vector<2x64xf32>
    %cst_62 = arith.constant dense<0.000000e+00> : vector<2x64xf32>
    %245 = tpu.matmul %238, %8, %cst_62 {dimension_numbers = #tpu.dot_dimension_numbers<[1], [0], [0], [1], [0, 0, 1, 1], [], []>} : vector<2x16xf32>, vector<16x64xf32>, vector<2x64xf32> -> vector<2x64xf32>
    %246 = arith.addf %244, %245 : vector<2x64xf32>
    %247 = vector.extract_strided_slice %246 {offsets = [0, 0], sizes = [2, 16], strides = [1, 1]} : vector<2x64xf32> to vector<2x16xf32>
    %248 = arith.negf %247 : vector<2x16xf32>
    %249 = math.exp %248 : vector<2x16xf32>
    %cst_63 = arith.constant 1.000000e+00 : f32
    %250 = vector.broadcast %cst_63 : f32 to vector<2x16xf32>
    %251 = arith.addf %250, %249 : vector<2x16xf32>
    %252 = arith.divf %250, %251 : vector<2x16xf32>
    %253 = vector.extract_strided_slice %246 {offsets = [0, 16], sizes = [2, 16], strides = [1, 1]} : vector<2x64xf32> to vector<2x16xf32>
    %254 = arith.negf %253 : vector<2x16xf32>
    %255 = math.exp %254 : vector<2x16xf32>
    %cst_64 = arith.constant 1.000000e+00 : f32
    %256 = vector.broadcast %cst_64 : f32 to vector<2x16xf32>
    %257 = arith.addf %256, %255 : vector<2x16xf32>
    %258 = arith.divf %256, %257 : vector<2x16xf32>
    %259 = vector.extract_strided_slice %246 {offsets = [0, 32], sizes = [2, 16], strides = [1, 1]} : vector<2x64xf32> to vector<2x16xf32>
    %260 = math.tanh %259 : vector<2x16xf32>
    %261 = vector.extract_strided_slice %246 {offsets = [0, 48], sizes = [2, 16], strides = [1, 1]} : vector<2x64xf32> to vector<2x16xf32>
    %262 = arith.negf %261 : vector<2x16xf32>
    %263 = math.exp %262 : vector<2x16xf32>
    %cst_65 = arith.constant 1.000000e+00 : f32
    %264 = vector.broadcast %cst_65 : f32 to vector<2x16xf32>
    %265 = arith.addf %264, %263 : vector<2x16xf32>
    %266 = arith.divf %264, %265 : vector<2x16xf32>
    %267 = arith.mulf %258, %236 : vector<2x16xf32>
    %268 = arith.mulf %252, %260 : vector<2x16xf32>
    %269 = arith.addf %267, %268 : vector<2x16xf32>
    %270 = math.tanh %269 : vector<2x16xf32>
    %271 = arith.mulf %266, %270 : vector<2x16xf32>
    %272 = arith.index_cast %242 : i32 to index
    %c0_66 = arith.constant 0 : index
    %273 = vector.load %arg14[%272, %c0_66] : memref<16x16xf32, #tpu.memory_space<vmem>>, vector<2x16xf32>
    tpu.vector_store %arg14[%272, %c0_66], %271 {strides = array<i32>} : memref<16x16xf32, #tpu.memory_space<vmem>>, vector<2x16xf32>,
    %c8_i32 = arith.constant 8 : i32
    %c0_67 = arith.constant 0 : index
    %c0_68 = arith.constant 0 : index
    %274 = vector.load %arg14[%c0_67, %c0_68] : memref<16x16xf32, #tpu.memory_space<vmem>>, vector<16x16xf32>
    %c0_69 = arith.constant 0 : index
    %c0_70 = arith.constant 0 : index
    %275 = vector.load %arg5[%c0_69, %c0_70] : memref<16x8xf32, #tpu.memory_space<vmem>>, vector<16x8xf32>
    %cst_71 = arith.constant dense<0.000000e+00> : vector<16x8xf32>
    %276 = tpu.matmul %274, %275, %cst_71 {dimension_numbers = #tpu.dot_dimension_numbers<[1], [0], [0], [1], [0, 0, 1, 1], [], []>} : vector<16x16xf32>, vector<16x8xf32>, vector<16x8xf32> -> vector<16x8xf32>
    %c0_72 = arith.constant 0 : index
    %c0_73 = arith.constant 0 : index
    %277 = vector.load %arg6[%c0_72, %c0_73] : memref<1x8xf32, #tpu.memory_space<vmem>>, vector<1x8xf32>
    %278 = vector.broadcast %277 : vector<1x8xf32> to vector<16x8xf32>
    %279 = arith.addf %276, %278 : vector<16x8xf32>
    %c0_74 = arith.constant 0 : index
    %c0_75 = arith.constant 0 : index
    %280 = vector.load %arg7[%c0_74, %c0_75] : memref<8x16xf32, #tpu.memory_space<vmem>>, vector<8x16xf32>
    %cst_76 = arith.constant dense<0.000000e+00> : vector<16x16xf32>
    %281 = tpu.matmul %279, %280, %cst_76 {dimension_numbers = #tpu.dot_dimension_numbers<[1], [0], [0], [1], [0, 0, 1, 1], [], []>} : vector<16x8xf32>, vector<8x16xf32>, vector<16x16xf32> -> vector<16x16xf32>
    %c0_77 = arith.constant 0 : index
    %c0_78 = arith.constant 0 : index
    %282 = vector.load %arg8[%c0_77, %c0_78] : memref<1x16xf32, #tpu.memory_space<vmem>>, vector<1x16xf32>
    %283 = vector.broadcast %282 : vector<1x16xf32> to vector<16x16xf32>
    %284 = arith.addf %281, %283 : vector<16x16xf32>
    %c0_79 = arith.constant 0 : index
    %c0_80 = arith.constant 0 : index
    %285 = vector.load %arg9[%c0_79, %c0_80] : memref<16x32xf32, #tpu.memory_space<vmem>>, vector<16x32xf32>
    %cst_81 = arith.constant dense<0.000000e+00> : vector<16x32xf32>
    %286 = tpu.matmul %284, %285, %cst_81 {dimension_numbers = #tpu.dot_dimension_numbers<[1], [0], [0], [1], [0, 0, 1, 1], [], []>} : vector<16x16xf32>, vector<16x32xf32>, vector<16x32xf32> -> vector<16x32xf32>
    %c0_82 = arith.constant 0 : index
    %c0_83 = arith.constant 0 : index
    %287 = vector.load %arg11[%c0_82, %c0_83] : memref<1x32xf32, #tpu.memory_space<vmem>>, vector<1x32xf32>
    %288 = vector.broadcast %287 : vector<1x32xf32> to vector<16x32xf32>
    %289 = arith.addf %286, %288 : vector<16x32xf32>
    %c0_84 = arith.constant 0 : index
    %c0_85 = arith.constant 0 : index
    %290 = vector.load %arg15[%c0_84, %c0_85] : memref<16x32xf32, #tpu.memory_space<vmem>>, vector<16x32xf32>
    tpu.vector_store %arg15[%c0_84, %c0_85], %289 {strides = array<i32>} : memref<16x32xf32, #tpu.memory_space<vmem>>, vector<16x32xf32>,
    %c0_86 = arith.constant 0 : index
    %c0_87 = arith.constant 0 : index
    %291 = vector.load %arg10[%c0_86, %c0_87] : memref<8x32xf32, #tpu.memory_space<vmem>>, vector<8x32xf32>
    %cst_88 = arith.constant 0.000000e+00 : f32
    %292 = vector.broadcast %cst_88 : f32 to vector<2x8xf32>
    %c0_i32_89 = arith.constant 0 : i32
    %c2_i32_90 = arith.constant 2 : i32
    %293 = arith.muli %c0_i32_89, %c2_i32_90 : i32
    %294 = tpu.assume_multiple %293, 2 : i32
    %295 = arith.index_cast %294 : i32 to index
    %c0_91 = arith.constant 0 : index
    %296 = vector.load %arg15[%295, %c0_91] : memref<16x32xf32, #tpu.memory_space<vmem>>, vector<2x32xf32>
    %cst_92 = arith.constant dense<0.000000e+00> : vector<2x32xf32>
    %297 = tpu.matmul %292, %291, %cst_92 {dimension_numbers = #tpu.dot_dimension_numbers<[1], [0], [0], [1], [0, 0, 1, 1], [], []>} : vector<2x8xf32>, vector<8x32xf32>, vector<2x32xf32> -> vector<2x32xf32>
    %298 = arith.addf %296, %297 : vector<2x32xf32>
    %299 = vector.extract_strided_slice %298 {offsets = [0, 0], sizes = [2, 8], strides = [1, 1]} : vector<2x32xf32> to vector<2x8xf32>
    %300 = arith.negf %299 : vector<2x8xf32>
    %301 = math.exp %300 : vector<2x8xf32>
    %cst_93 = arith.constant 1.000000e+00 : f32
    %302 = vector.broadcast %cst_93 : f32 to vector<2x8xf32>
    %303 = arith.addf %302, %301 : vector<2x8xf32>
    %304 = arith.divf %302, %303 : vector<2x8xf32>
    %305 = vector.extract_strided_slice %298 {offsets = [0, 8], sizes = [2, 8], strides = [1, 1]} : vector<2x32xf32> to vector<2x8xf32>
    %306 = arith.negf %305 : vector<2x8xf32>
    %307 = math.exp %306 : vector<2x8xf32>
    %cst_94 = arith.constant 1.000000e+00 : f32
    %308 = vector.broadcast %cst_94 : f32 to vector<2x8xf32>
    %309 = arith.addf %308, %307 : vector<2x8xf32>
    %310 = arith.divf %308, %309 : vector<2x8xf32>
    %311 = vector.extract_strided_slice %298 {offsets = [0, 16], sizes = [2, 8], strides = [1, 1]} : vector<2x32xf32> to vector<2x8xf32>
    %312 = math.tanh %311 : vector<2x8xf32>
    %313 = vector.extract_strided_slice %298 {offsets = [0, 24], sizes = [2, 8], strides = [1, 1]} : vector<2x32xf32> to vector<2x8xf32>
    %314 = arith.negf %313 : vector<2x8xf32>
    %315 = math.exp %314 : vector<2x8xf32>
    %cst_95 = arith.constant 1.000000e+00 : f32
    %316 = vector.broadcast %cst_95 : f32 to vector<2x8xf32>
    %317 = arith.addf %316, %315 : vector<2x8xf32>
    %318 = arith.divf %316, %317 : vector<2x8xf32>
    %319 = arith.mulf %310, %292 : vector<2x8xf32>
    %320 = arith.mulf %304, %312 : vector<2x8xf32>
    %321 = arith.addf %319, %320 : vector<2x8xf32>
    %322 = math.tanh %321 : vector<2x8xf32>
    %323 = arith.mulf %318, %322 : vector<2x8xf32>
    %c0_96 = arith.constant 0 : index
    %324 = arith.index_cast %294 : i32 to index
    %c0_97 = arith.constant 0 : index
    %325 = vector.load %arg12[%c0_96, %324, %c0_97] : memref<1x16x8xf32, #tpu.memory_space<vmem>>, vector<1x2x8xf32>
    %326 = vector.shape_cast %325 : vector<1x2x8xf32> to vector<2x8xf32>
    %327 = vector.shape_cast %323 : vector<2x8xf32> to vector<1x2x8xf32>
    tpu.vector_store %arg12[%c0_96, %324, %c0_97], %327 {strides = array<i32>} : memref<1x16x8xf32, #tpu.memory_space<vmem>>, vector<1x2x8xf32>,
    %c1_i32_98 = arith.constant 1 : i32
    %c2_i32_99 = arith.constant 2 : i32
    %328 = arith.muli %c1_i32_98, %c2_i32_99 : i32
    %329 = tpu.assume_multiple %328, 2 : i32
    %330 = arith.index_cast %329 : i32 to index
    %c0_100 = arith.constant 0 : index
    %331 = vector.load %arg15[%330, %c0_100] : memref<16x32xf32, #tpu.memory_space<vmem>>, vector<2x32xf32>
    %cst_101 = arith.constant dense<0.000000e+00> : vector<2x32xf32>
    %332 = tpu.matmul %323, %291, %cst_101 {dimension_numbers = #tpu.dot_dimension_numbers<[1], [0], [0], [1], [0, 0, 1, 1], [], []>} : vector<2x8xf32>, vector<8x32xf32>, vector<2x32xf32> -> vector<2x32xf32>
    %333 = arith.addf %331, %332 : vector<2x32xf32>
    %334 = vector.extract_strided_slice %333 {offsets = [0, 0], sizes = [2, 8], strides = [1, 1]} : vector<2x32xf32> to vector<2x8xf32>
    %335 = arith.negf %334 : vector<2x8xf32>
    %336 = math.exp %335 : vector<2x8xf32>
    %cst_102 = arith.constant 1.000000e+00 : f32
    %337 = vector.broadcast %cst_102 : f32 to vector<2x8xf32>
    %338 = arith.addf %337, %336 : vector<2x8xf32>
    %339 = arith.divf %337, %338 : vector<2x8xf32>
    %340 = vector.extract_strided_slice %333 {offsets = [0, 8], sizes = [2, 8], strides = [1, 1]} : vector<2x32xf32> to vector<2x8xf32>
    %341 = arith.negf %340 : vector<2x8xf32>
    %342 = math.exp %341 : vector<2x8xf32>
    %cst_103 = arith.constant 1.000000e+00 : f32
    %343 = vector.broadcast %cst_103 : f32 to vector<2x8xf32>
    %344 = arith.addf %343, %342 : vector<2x8xf32>
    %345 = arith.divf %343, %344 : vector<2x8xf32>
    %346 = vector.extract_strided_slice %333 {offsets = [0, 16], sizes = [2, 8], strides = [1, 1]} : vector<2x32xf32> to vector<2x8xf32>
    %347 = math.tanh %346 : vector<2x8xf32>
    %348 = vector.extract_strided_slice %333 {offsets = [0, 24], sizes = [2, 8], strides = [1, 1]} : vector<2x32xf32> to vector<2x8xf32>
    %349 = arith.negf %348 : vector<2x8xf32>
    %350 = math.exp %349 : vector<2x8xf32>
    %cst_104 = arith.constant 1.000000e+00 : f32
    %351 = vector.broadcast %cst_104 : f32 to vector<2x8xf32>
    %352 = arith.addf %351, %350 : vector<2x8xf32>
    %353 = arith.divf %351, %352 : vector<2x8xf32>
    %354 = arith.mulf %345, %321 : vector<2x8xf32>
    %355 = arith.mulf %339, %347 : vector<2x8xf32>
    %356 = arith.addf %354, %355 : vector<2x8xf32>
    %357 = math.tanh %356 : vector<2x8xf32>
    %358 = arith.mulf %353, %357 : vector<2x8xf32>
    %c0_105 = arith.constant 0 : index
    %359 = arith.index_cast %329 : i32 to index
    %c0_106 = arith.constant 0 : index
    %360 = vector.load %arg12[%c0_105, %359, %c0_106] : memref<1x16x8xf32, #tpu.memory_space<vmem>>, vector<1x2x8xf32>
    %361 = vector.shape_cast %360 : vector<1x2x8xf32> to vector<2x8xf32>
    %362 = vector.shape_cast %358 : vector<2x8xf32> to vector<1x2x8xf32>
    tpu.vector_store %arg12[%c0_105, %359, %c0_106], %362 {strides = array<i32>} : memref<1x16x8xf32, #tpu.memory_space<vmem>>, vector<1x2x8xf32>,
    %c2_i32_107 = arith.constant 2 : i32
    %c2_i32_108 = arith.constant 2 : i32
    %363 = arith.muli %c2_i32_107, %c2_i32_108 : i32
    %364 = tpu.assume_multiple %363, 2 : i32
    %365 = arith.index_cast %364 : i32 to index
    %c0_109 = arith.constant 0 : index
    %366 = vector.load %arg15[%365, %c0_109] : memref<16x32xf32, #tpu.memory_space<vmem>>, vector<2x32xf32>
    %cst_110 = arith.constant dense<0.000000e+00> : vector<2x32xf32>
    %367 = tpu.matmul %358, %291, %cst_110 {dimension_numbers = #tpu.dot_dimension_numbers<[1], [0], [0], [1], [0, 0, 1, 1], [], []>} : vector<2x8xf32>, vector<8x32xf32>, vector<2x32xf32> -> vector<2x32xf32>
    %368 = arith.addf %366, %367 : vector<2x32xf32>
    %369 = vector.extract_strided_slice %368 {offsets = [0, 0], sizes = [2, 8], strides = [1, 1]} : vector<2x32xf32> to vector<2x8xf32>
    %370 = arith.negf %369 : vector<2x8xf32>
    %371 = math.exp %370 : vector<2x8xf32>
    %cst_111 = arith.constant 1.000000e+00 : f32
    %372 = vector.broadcast %cst_111 : f32 to vector<2x8xf32>
    %373 = arith.addf %372, %371 : vector<2x8xf32>
    %374 = arith.divf %372, %373 : vector<2x8xf32>
    %375 = vector.extract_strided_slice %368 {offsets = [0, 8], sizes = [2, 8], strides = [1, 1]} : vector<2x32xf32> to vector<2x8xf32>
    %376 = arith.negf %375 : vector<2x8xf32>
    %377 = math.exp %376 : vector<2x8xf32>
    %cst_112 = arith.constant 1.000000e+00 : f32
    %378 = vector.broadcast %cst_112 : f32 to vector<2x8xf32>
    %379 = arith.addf %378, %377 : vector<2x8xf32>
    %380 = arith.divf %378, %379 : vector<2x8xf32>
    %381 = vector.extract_strided_slice %368 {offsets = [0, 16], sizes = [2, 8], strides = [1, 1]} : vector<2x32xf32> to vector<2x8xf32>
    %382 = math.tanh %381 : vector<2x8xf32>
    %383 = vector.extract_strided_slice %368 {offsets = [0, 24], sizes = [2, 8], strides = [1, 1]} : vector<2x32xf32> to vector<2x8xf32>
    %384 = arith.negf %383 : vector<2x8xf32>
    %385 = math.exp %384 : vector<2x8xf32>
    %cst_113 = arith.constant 1.000000e+00 : f32
    %386 = vector.broadcast %cst_113 : f32 to vector<2x8xf32>
    %387 = arith.addf %386, %385 : vector<2x8xf32>
    %388 = arith.divf %386, %387 : vector<2x8xf32>
    %389 = arith.mulf %380, %356 : vector<2x8xf32>
    %390 = arith.mulf %374, %382 : vector<2x8xf32>
    %391 = arith.addf %389, %390 : vector<2x8xf32>
    %392 = math.tanh %391 : vector<2x8xf32>
    %393 = arith.mulf %388, %392 : vector<2x8xf32>
    %c0_114 = arith.constant 0 : index
    %394 = arith.index_cast %364 : i32 to index
    %c0_115 = arith.constant 0 : index
    %395 = vector.load %arg12[%c0_114, %394, %c0_115] : memref<1x16x8xf32, #tpu.memory_space<vmem>>, vector<1x2x8xf32>
    %396 = vector.shape_cast %395 : vector<1x2x8xf32> to vector<2x8xf32>
    %397 = vector.shape_cast %393 : vector<2x8xf32> to vector<1x2x8xf32>
    tpu.vector_store %arg12[%c0_114, %394, %c0_115], %397 {strides = array<i32>} : memref<1x16x8xf32, #tpu.memory_space<vmem>>, vector<1x2x8xf32>,
    %c3_i32_116 = arith.constant 3 : i32
    %c2_i32_117 = arith.constant 2 : i32
    %398 = arith.muli %c3_i32_116, %c2_i32_117 : i32
    %399 = tpu.assume_multiple %398, 2 : i32
    %400 = arith.index_cast %399 : i32 to index
    %c0_118 = arith.constant 0 : index
    %401 = vector.load %arg15[%400, %c0_118] : memref<16x32xf32, #tpu.memory_space<vmem>>, vector<2x32xf32>
    %cst_119 = arith.constant dense<0.000000e+00> : vector<2x32xf32>
    %402 = tpu.matmul %393, %291, %cst_119 {dimension_numbers = #tpu.dot_dimension_numbers<[1], [0], [0], [1], [0, 0, 1, 1], [], []>} : vector<2x8xf32>, vector<8x32xf32>, vector<2x32xf32> -> vector<2x32xf32>
    %403 = arith.addf %401, %402 : vector<2x32xf32>
    %404 = vector.extract_strided_slice %403 {offsets = [0, 0], sizes = [2, 8], strides = [1, 1]} : vector<2x32xf32> to vector<2x8xf32>
    %405 = arith.negf %404 : vector<2x8xf32>
    %406 = math.exp %405 : vector<2x8xf32>
    %cst_120 = arith.constant 1.000000e+00 : f32
    %407 = vector.broadcast %cst_120 : f32 to vector<2x8xf32>
    %408 = arith.addf %407, %406 : vector<2x8xf32>
    %409 = arith.divf %407, %408 : vector<2x8xf32>
    %410 = vector.extract_strided_slice %403 {offsets = [0, 8], sizes = [2, 8], strides = [1, 1]} : vector<2x32xf32> to vector<2x8xf32>
    %411 = arith.negf %410 : vector<2x8xf32>
    %412 = math.exp %411 : vector<2x8xf32>
    %cst_121 = arith.constant 1.000000e+00 : f32
    %413 = vector.broadcast %cst_121 : f32 to vector<2x8xf32>
    %414 = arith.addf %413, %412 : vector<2x8xf32>
    %415 = arith.divf %413, %414 : vector<2x8xf32>
    %416 = vector.extract_strided_slice %403 {offsets = [0, 16], sizes = [2, 8], strides = [1, 1]} : vector<2x32xf32> to vector<2x8xf32>
    %417 = math.tanh %416 : vector<2x8xf32>
    %418 = vector.extract_strided_slice %403 {offsets = [0, 24], sizes = [2, 8], strides = [1, 1]} : vector<2x32xf32> to vector<2x8xf32>
    %419 = arith.negf %418 : vector<2x8xf32>
    %420 = math.exp %419 : vector<2x8xf32>
    %cst_122 = arith.constant 1.000000e+00 : f32
    %421 = vector.broadcast %cst_122 : f32 to vector<2x8xf32>
    %422 = arith.addf %421, %420 : vector<2x8xf32>
    %423 = arith.divf %421, %422 : vector<2x8xf32>
    %424 = arith.mulf %415, %391 : vector<2x8xf32>
    %425 = arith.mulf %409, %417 : vector<2x8xf32>
    %426 = arith.addf %424, %425 : vector<2x8xf32>
    %427 = math.tanh %426 : vector<2x8xf32>
    %428 = arith.mulf %423, %427 : vector<2x8xf32>
    %c0_123 = arith.constant 0 : index
    %429 = arith.index_cast %399 : i32 to index
    %c0_124 = arith.constant 0 : index
    %430 = vector.load %arg12[%c0_123, %429, %c0_124] : memref<1x16x8xf32, #tpu.memory_space<vmem>>, vector<1x2x8xf32>
    %431 = vector.shape_cast %430 : vector<1x2x8xf32> to vector<2x8xf32>
    %432 = vector.shape_cast %428 : vector<2x8xf32> to vector<1x2x8xf32>
    tpu.vector_store %arg12[%c0_123, %429, %c0_124], %432 {strides = array<i32>} : memref<1x16x8xf32, #tpu.memory_space<vmem>>, vector<1x2x8xf32>,
    %c4_i32_125 = arith.constant 4 : i32
    %c2_i32_126 = arith.constant 2 : i32
    %433 = arith.muli %c4_i32_125, %c2_i32_126 : i32
    %434 = tpu.assume_multiple %433, 2 : i32
    %435 = arith.index_cast %434 : i32 to index
    %c0_127 = arith.constant 0 : index
    %436 = vector.load %arg15[%435, %c0_127] : memref<16x32xf32, #tpu.memory_space<vmem>>, vector<2x32xf32>
    %cst_128 = arith.constant dense<0.000000e+00> : vector<2x32xf32>
    %437 = tpu.matmul %428, %291, %cst_128 {dimension_numbers = #tpu.dot_dimension_numbers<[1], [0], [0], [1], [0, 0, 1, 1], [], []>} : vector<2x8xf32>, vector<8x32xf32>, vector<2x32xf32> -> vector<2x32xf32>
    %438 = arith.addf %436, %437 : vector<2x32xf32>
    %439 = vector.extract_strided_slice %438 {offsets = [0, 0], sizes = [2, 8], strides = [1, 1]} : vector<2x32xf32> to vector<2x8xf32>
    %440 = arith.negf %439 : vector<2x8xf32>
    %441 = math.exp %440 : vector<2x8xf32>
    %cst_129 = arith.constant 1.000000e+00 : f32
    %442 = vector.broadcast %cst_129 : f32 to vector<2x8xf32>
    %443 = arith.addf %442, %441 : vector<2x8xf32>
    %444 = arith.divf %442, %443 : vector<2x8xf32>
    %445 = vector.extract_strided_slice %438 {offsets = [0, 8], sizes = [2, 8], strides = [1, 1]} : vector<2x32xf32> to vector<2x8xf32>
    %446 = arith.negf %445 : vector<2x8xf32>
    %447 = math.exp %446 : vector<2x8xf32>
    %cst_130 = arith.constant 1.000000e+00 : f32
    %448 = vector.broadcast %cst_130 : f32 to vector<2x8xf32>
    %449 = arith.addf %448, %447 : vector<2x8xf32>
    %450 = arith.divf %448, %449 : vector<2x8xf32>
    %451 = vector.extract_strided_slice %438 {offsets = [0, 16], sizes = [2, 8], strides = [1, 1]} : vector<2x32xf32> to vector<2x8xf32>
    %452 = math.tanh %451 : vector<2x8xf32>
    %453 = vector.extract_strided_slice %438 {offsets = [0, 24], sizes = [2, 8], strides = [1, 1]} : vector<2x32xf32> to vector<2x8xf32>
    %454 = arith.negf %453 : vector<2x8xf32>
    %455 = math.exp %454 : vector<2x8xf32>
    %cst_131 = arith.constant 1.000000e+00 : f32
    %456 = vector.broadcast %cst_131 : f32 to vector<2x8xf32>
    %457 = arith.addf %456, %455 : vector<2x8xf32>
    %458 = arith.divf %456, %457 : vector<2x8xf32>
    %459 = arith.mulf %450, %426 : vector<2x8xf32>
    %460 = arith.mulf %444, %452 : vector<2x8xf32>
    %461 = arith.addf %459, %460 : vector<2x8xf32>
    %462 = math.tanh %461 : vector<2x8xf32>
    %463 = arith.mulf %458, %462 : vector<2x8xf32>
    %c0_132 = arith.constant 0 : index
    %464 = arith.index_cast %434 : i32 to index
    %c0_133 = arith.constant 0 : index
    %465 = vector.load %arg12[%c0_132, %464, %c0_133] : memref<1x16x8xf32, #tpu.memory_space<vmem>>, vector<1x2x8xf32>
    %466 = vector.shape_cast %465 : vector<1x2x8xf32> to vector<2x8xf32>
    %467 = vector.shape_cast %463 : vector<2x8xf32> to vector<1x2x8xf32>
    tpu.vector_store %arg12[%c0_132, %464, %c0_133], %467 {strides = array<i32>} : memref<1x16x8xf32, #tpu.memory_space<vmem>>, vector<1x2x8xf32>,
    %c5_i32_134 = arith.constant 5 : i32
    %c2_i32_135 = arith.constant 2 : i32
    %468 = arith.muli %c5_i32_134, %c2_i32_135 : i32
    %469 = tpu.assume_multiple %468, 2 : i32
    %470 = arith.index_cast %469 : i32 to index
    %c0_136 = arith.constant 0 : index
    %471 = vector.load %arg15[%470, %c0_136] : memref<16x32xf32, #tpu.memory_space<vmem>>, vector<2x32xf32>
    %cst_137 = arith.constant dense<0.000000e+00> : vector<2x32xf32>
    %472 = tpu.matmul %463, %291, %cst_137 {dimension_numbers = #tpu.dot_dimension_numbers<[1], [0], [0], [1], [0, 0, 1, 1], [], []>} : vector<2x8xf32>, vector<8x32xf32>, vector<2x32xf32> -> vector<2x32xf32>
    %473 = arith.addf %471, %472 : vector<2x32xf32>
    %474 = vector.extract_strided_slice %473 {offsets = [0, 0], sizes = [2, 8], strides = [1, 1]} : vector<2x32xf32> to vector<2x8xf32>
    %475 = arith.negf %474 : vector<2x8xf32>
    %476 = math.exp %475 : vector<2x8xf32>
    %cst_138 = arith.constant 1.000000e+00 : f32
    %477 = vector.broadcast %cst_138 : f32 to vector<2x8xf32>
    %478 = arith.addf %477, %476 : vector<2x8xf32>
    %479 = arith.divf %477, %478 : vector<2x8xf32>
    %480 = vector.extract_strided_slice %473 {offsets = [0, 8], sizes = [2, 8], strides = [1, 1]} : vector<2x32xf32> to vector<2x8xf32>
    %481 = arith.negf %480 : vector<2x8xf32>
    %482 = math.exp %481 : vector<2x8xf32>
    %cst_139 = arith.constant 1.000000e+00 : f32
    %483 = vector.broadcast %cst_139 : f32 to vector<2x8xf32>
    %484 = arith.addf %483, %482 : vector<2x8xf32>
    %485 = arith.divf %483, %484 : vector<2x8xf32>
    %486 = vector.extract_strided_slice %473 {offsets = [0, 16], sizes = [2, 8], strides = [1, 1]} : vector<2x32xf32> to vector<2x8xf32>
    %487 = math.tanh %486 : vector<2x8xf32>
    %488 = vector.extract_strided_slice %473 {offsets = [0, 24], sizes = [2, 8], strides = [1, 1]} : vector<2x32xf32> to vector<2x8xf32>
    %489 = arith.negf %488 : vector<2x8xf32>
    %490 = math.exp %489 : vector<2x8xf32>
    %cst_140 = arith.constant 1.000000e+00 : f32
    %491 = vector.broadcast %cst_140 : f32 to vector<2x8xf32>
    %492 = arith.addf %491, %490 : vector<2x8xf32>
    %493 = arith.divf %491, %492 : vector<2x8xf32>
    %494 = arith.mulf %485, %461 : vector<2x8xf32>
    %495 = arith.mulf %479, %487 : vector<2x8xf32>
    %496 = arith.addf %494, %495 : vector<2x8xf32>
    %497 = math.tanh %496 : vector<2x8xf32>
    %498 = arith.mulf %493, %497 : vector<2x8xf32>
    %c0_141 = arith.constant 0 : index
    %499 = arith.index_cast %469 : i32 to index
    %c0_142 = arith.constant 0 : index
    %500 = vector.load %arg12[%c0_141, %499, %c0_142] : memref<1x16x8xf32, #tpu.memory_space<vmem>>, vector<1x2x8xf32>
    %501 = vector.shape_cast %500 : vector<1x2x8xf32> to vector<2x8xf32>
    %502 = vector.shape_cast %498 : vector<2x8xf32> to vector<1x2x8xf32>
    tpu.vector_store %arg12[%c0_141, %499, %c0_142], %502 {strides = array<i32>} : memref<1x16x8xf32, #tpu.memory_space<vmem>>, vector<1x2x8xf32>,
    %c6_i32_143 = arith.constant 6 : i32
    %c2_i32_144 = arith.constant 2 : i32
    %503 = arith.muli %c6_i32_143, %c2_i32_144 : i32
    %504 = tpu.assume_multiple %503, 2 : i32
    %505 = arith.index_cast %504 : i32 to index
    %c0_145 = arith.constant 0 : index
    %506 = vector.load %arg15[%505, %c0_145] : memref<16x32xf32, #tpu.memory_space<vmem>>, vector<2x32xf32>
    %cst_146 = arith.constant dense<0.000000e+00> : vector<2x32xf32>
    %507 = tpu.matmul %498, %291, %cst_146 {dimension_numbers = #tpu.dot_dimension_numbers<[1], [0], [0], [1], [0, 0, 1, 1], [], []>} : vector<2x8xf32>, vector<8x32xf32>, vector<2x32xf32> -> vector<2x32xf32>
    %508 = arith.addf %506, %507 : vector<2x32xf32>
    %509 = vector.extract_strided_slice %508 {offsets = [0, 0], sizes = [2, 8], strides = [1, 1]} : vector<2x32xf32> to vector<2x8xf32>
    %510 = arith.negf %509 : vector<2x8xf32>
    %511 = math.exp %510 : vector<2x8xf32>
    %cst_147 = arith.constant 1.000000e+00 : f32
    %512 = vector.broadcast %cst_147 : f32 to vector<2x8xf32>
    %513 = arith.addf %512, %511 : vector<2x8xf32>
    %514 = arith.divf %512, %513 : vector<2x8xf32>
    %515 = vector.extract_strided_slice %508 {offsets = [0, 8], sizes = [2, 8], strides = [1, 1]} : vector<2x32xf32> to vector<2x8xf32>
    %516 = arith.negf %515 : vector<2x8xf32>
    %517 = math.exp %516 : vector<2x8xf32>
    %cst_148 = arith.constant 1.000000e+00 : f32
    %518 = vector.broadcast %cst_148 : f32 to vector<2x8xf32>
    %519 = arith.addf %518, %517 : vector<2x8xf32>
    %520 = arith.divf %518, %519 : vector<2x8xf32>
    %521 = vector.extract_strided_slice %508 {offsets = [0, 16], sizes = [2, 8], strides = [1, 1]} : vector<2x32xf32> to vector<2x8xf32>
    %522 = math.tanh %521 : vector<2x8xf32>
    %523 = vector.extract_strided_slice %508 {offsets = [0, 24], sizes = [2, 8], strides = [1, 1]} : vector<2x32xf32> to vector<2x8xf32>
    %524 = arith.negf %523 : vector<2x8xf32>
    %525 = math.exp %524 : vector<2x8xf32>
    %cst_149 = arith.constant 1.000000e+00 : f32
    %526 = vector.broadcast %cst_149 : f32 to vector<2x8xf32>
    %527 = arith.addf %526, %525 : vector<2x8xf32>
    %528 = arith.divf %526, %527 : vector<2x8xf32>
    %529 = arith.mulf %520, %496 : vector<2x8xf32>
    %530 = arith.mulf %514, %522 : vector<2x8xf32>
    %531 = arith.addf %529, %530 : vector<2x8xf32>
    %532 = math.tanh %531 : vector<2x8xf32>
    %533 = arith.mulf %528, %532 : vector<2x8xf32>
    %c0_150 = arith.constant 0 : index
    %534 = arith.index_cast %504 : i32 to index
    %c0_151 = arith.constant 0 : index
    %535 = vector.load %arg12[%c0_150, %534, %c0_151] : memref<1x16x8xf32, #tpu.memory_space<vmem>>, vector<1x2x8xf32>
    %536 = vector.shape_cast %535 : vector<1x2x8xf32> to vector<2x8xf32>
    %537 = vector.shape_cast %533 : vector<2x8xf32> to vector<1x2x8xf32>
    tpu.vector_store %arg12[%c0_150, %534, %c0_151], %537 {strides = array<i32>} : memref<1x16x8xf32, #tpu.memory_space<vmem>>, vector<1x2x8xf32>,
    %c7_i32_152 = arith.constant 7 : i32
    %c2_i32_153 = arith.constant 2 : i32
    %538 = arith.muli %c7_i32_152, %c2_i32_153 : i32
    %539 = tpu.assume_multiple %538, 2 : i32
    %540 = arith.index_cast %539 : i32 to index
    %c0_154 = arith.constant 0 : index
    %541 = vector.load %arg15[%540, %c0_154] : memref<16x32xf32, #tpu.memory_space<vmem>>, vector<2x32xf32>
    %cst_155 = arith.constant dense<0.000000e+00> : vector<2x32xf32>
    %542 = tpu.matmul %533, %291, %cst_155 {dimension_numbers = #tpu.dot_dimension_numbers<[1], [0], [0], [1], [0, 0, 1, 1], [], []>} : vector<2x8xf32>, vector<8x32xf32>, vector<2x32xf32> -> vector<2x32xf32>
    %543 = arith.addf %541, %542 : vector<2x32xf32>
    %544 = vector.extract_strided_slice %543 {offsets = [0, 0], sizes = [2, 8], strides = [1, 1]} : vector<2x32xf32> to vector<2x8xf32>
    %545 = arith.negf %544 : vector<2x8xf32>
    %546 = math.exp %545 : vector<2x8xf32>
    %cst_156 = arith.constant 1.000000e+00 : f32
    %547 = vector.broadcast %cst_156 : f32 to vector<2x8xf32>
    %548 = arith.addf %547, %546 : vector<2x8xf32>
    %549 = arith.divf %547, %548 : vector<2x8xf32>
    %550 = vector.extract_strided_slice %543 {offsets = [0, 8], sizes = [2, 8], strides = [1, 1]} : vector<2x32xf32> to vector<2x8xf32>
    %551 = arith.negf %550 : vector<2x8xf32>
    %552 = math.exp %551 : vector<2x8xf32>
    %cst_157 = arith.constant 1.000000e+00 : f32
    %553 = vector.broadcast %cst_157 : f32 to vector<2x8xf32>
    %554 = arith.addf %553, %552 : vector<2x8xf32>
    %555 = arith.divf %553, %554 : vector<2x8xf32>
    %556 = vector.extract_strided_slice %543 {offsets = [0, 16], sizes = [2, 8], strides = [1, 1]} : vector<2x32xf32> to vector<2x8xf32>
    %557 = math.tanh %556 : vector<2x8xf32>
    %558 = vector.extract_strided_slice %543 {offsets = [0, 24], sizes = [2, 8], strides = [1, 1]} : vector<2x32xf32> to vector<2x8xf32>
    %559 = arith.negf %558 : vector<2x8xf32>
    %560 = math.exp %559 : vector<2x8xf32>
    %cst_158 = arith.constant 1.000000e+00 : f32
    %561 = vector.broadcast %cst_158 : f32 to vector<2x8xf32>
    %562 = arith.addf %561, %560 : vector<2x8xf32>
    %563 = arith.divf %561, %562 : vector<2x8xf32>
    %564 = arith.mulf %555, %531 : vector<2x8xf32>
    %565 = arith.mulf %549, %557 : vector<2x8xf32>
    %566 = arith.addf %564, %565 : vector<2x8xf32>
    %567 = math.tanh %566 : vector<2x8xf32>
    %568 = arith.mulf %563, %567 : vector<2x8xf32>
    %c0_159 = arith.constant 0 : index
    %569 = arith.index_cast %539 : i32 to index
    %c0_160 = arith.constant 0 : index
    %570 = vector.load %arg12[%c0_159, %569, %c0_160] : memref<1x16x8xf32, #tpu.memory_space<vmem>>, vector<1x2x8xf32>
    %571 = vector.shape_cast %570 : vector<1x2x8xf32> to vector<2x8xf32>
    %572 = vector.shape_cast %568 : vector<2x8xf32> to vector<1x2x8xf32>
    tpu.vector_store %arg12[%c0_159, %569, %c0_160], %572 {strides = array<i32>} : memref<1x16x8xf32, #tpu.memory_space<vmem>>, vector<1x2x8xf32>,
    %c8_i32_161 = arith.constant 8 : i32
    return
  }
  func.func @transform_0(%arg0: i32) -> (i32, i32, i32) {
    %c0_i32 = arith.constant 0 : i32
    %c0_i32_0 = arith.constant 0 : i32
    %c0_i32_1 = arith.constant 0 : i32
    return %arg0, %c0_i32, %c0_i32_0 : i32, i32, i32
  }
  func.func @transform_1(%arg0: i32) -> (i32, i32) {
    %c0_i32 = arith.constant 0 : i32
    %c0_i32_0 = arith.constant 0 : i32
    %c0_i32_1 = arith.constant 0 : i32
    return %c0_i32, %c0_i32_0 : i32, i32
  }
  func.func @transform_2(%arg0: i32) -> (i32, i32) {
    %c0_i32 = arith.constant 0 : i32
    %c0_i32_0 = arith.constant 0 : i32
    %c0_i32_1 = arith.constant 0 : i32
    return %c0_i32, %c0_i32_0 : i32, i32
  }
  func.func @transform_3(%arg0: i32) -> (i32, i32) {
    %c0_i32 = arith.constant 0 : i32
    %c0_i32_0 = arith.constant 0 : i32
    %c0_i32_1 = arith.constant 0 : i32
    return %c0_i32, %c0_i32_0 : i32, i32
  }
  func.func @transform_4(%arg0: i32) -> (i32, i32) {
    %c0_i32 = arith.constant 0 : i32
    %c0_i32_0 = arith.constant 0 : i32
    %c0_i32_1 = arith.constant 0 : i32
    return %c0_i32, %c0_i32_0 : i32, i32
  }
  func.func @transform_5(%arg0: i32) -> (i32, i32) {
    %c0_i32 = arith.constant 0 : i32
    %c0_i32_0 = arith.constant 0 : i32
    %c0_i32_1 = arith.constant 0 : i32
    return %c0_i32, %c0_i32_0 : i32, i32
  }
  func.func @transform_6(%arg0: i32) -> (i32, i32) {
    %c0_i32 = arith.constant 0 : i32
    %c0_i32_0 = arith.constant 0 : i32
    %c0_i32_1 = arith.constant 0 : i32
    return %c0_i32, %c0_i32_0 : i32, i32
  }
  func.func @transform_7(%arg0: i32) -> (i32, i32) {
    %c0_i32 = arith.constant 0 : i32
    %c0_i32_0 = arith.constant 0 : i32
    %c0_i32_1 = arith.constant 0 : i32
    return %c0_i32, %c0_i32_0 : i32, i32
  }
  func.func @transform_8(%arg0: i32) -> (i32, i32) {
    %c0_i32 = arith.constant 0 : i32
    %c0_i32_0 = arith.constant 0 : i32
    %c0_i32_1 = arith.constant 0 : i32
    return %c0_i32, %c0_i32_0 : i32, i32
  }
  func.func @transform_9(%arg0: i32) -> (i32, i32) {
    %c0_i32 = arith.constant 0 : i32
    %c0_i32_0 = arith.constant 0 : i32
    %c0_i32_1 = arith.constant 0 : i32
    return %c0_i32, %c0_i32_0 : i32, i32
  }
  func.func @transform_10(%arg0: i32) -> (i32, i32) {
    %c0_i32 = arith.constant 0 : i32
    %c0_i32_0 = arith.constant 0 : i32
    %c0_i32_1 = arith.constant 0 : i32
    return %c0_i32, %c0_i32_0 : i32, i32
  }
  func.func @transform_11(%arg0: i32) -> (i32, i32, i32) {
    %c0_i32 = arith.constant 0 : i32
    %c0_i32_0 = arith.constant 0 : i32
    %c0_i32_1 = arith.constant 0 : i32
    return %arg0, %c0_i32, %c0_i32_0 : i32, i32, i32
  }
}

</mosaic_0001>

<bundles_post_ra>
// kernel: timeseries_autoencoder.1
= control target key start
LH: loop header
LB: loop body
LE: loop exit
PB: predicated region body
PF: predicated region fallthrough
CT: control target
= control target key end

     0   :  { %vm56_vm0 = vcmask 1043456   ;;  %vm49_vm1 = vcmask 97280   ;;  %vm2504_vm2 = vmmov 1   ;;  %v2505_v2 = vmov 0.0|0.0   ;;  %s2508_s28 = smov 96   ;;  %s2510_s29 = smov 32   ;;  %s2819_s1 = inlined_call_operand.vmem [shape: f32[12,64], index: 1, kind: input, shape index: {}]   ;;  %s2820_s0 = inlined_call_operand.vmem [shape: f32[1,16,12], index: 0, kind: input, shape index: {}]   ;;  %s2821_s2 = inlined_call_operand.vmem [shape: f32[16,64], index: 2, kind: input, shape index: {}]   ;;  %s2822_s3 = inlined_call_operand.vmem [shape: f32[1,64], index: 3, kind: input, shape index: {}]   ;;  %s2823_s4 = inlined_call_operand.vmem [shape: f32[16,8], index: 4, kind: input, shape index: {}]   ;;  %s2824_s6 = inlined_call_operand.vmem [shape: f32[8,16], index: 6, kind: input, shape index: {}]   ;;  %s2825_s5 = inlined_call_operand.vmem [shape: f32[1,8], index: 5, kind: input, shape index: {}]   ;;  %s2826_s8 = inlined_call_operand.vmem [shape: f32[16,32], index: 8, kind: input, shape index: {}]   ;;  %s2827_s9 = inlined_call_operand.vmem [shape: f32[8,32], index: 9, kind: input, shape index: {}]   ;;  %s2828_s7 = inlined_call_operand.vmem [shape: f32[1,16], index: 7, kind: input, shape index: {}]   ;;  %s2829_s10 = inlined_call_operand.vmem [shape: f32[1,32], index: 10, kind: input, shape index: {}]   ;;  %s2830_s11 = inlined_call_operand.vmem [shape: f32[1,16,8], index: 11, kind: output, shape index: {}]  }
   0x1   :  { %v40_v0 = vld [vmem:[%s2819_s1] sm:$0xff]  ;;  %v41_v1 = vld [vmem:[%s2819_s1 + $0x8] sm:$0xf]  ;;  %vm2328_vm3 = vmpackc.low %vm56_vm0, %vm2504_vm2  ;;  %2333 = vmatprep.subr.bf16.mxu1 %v2505_v2  ;;  %vm2506_vm4 = vmmov 0   ;;  %v2507_v6 = vmov 0.0   ;;  %vm135_vm5 = vcmask 523264  }
   0x2   :  { %v2327_v3 = vpack.c.bf16 %v41_v1, %v40_v0  ;;  %v38_v4 = vld [vmem:[%s2820_s0] sm:$0xff]  ;;  %2216 = vmatprep.mubr.msk.f32.mxu1 %vm2506_vm4, %v2507_v6  ;;  %v139_v7 = vld [vmem:[%s2821_s2 + $0x8] sm:$0xff]  ;;  %s2511_s30 = smov 80   ;;  %vm244_vm6 = vcmask 123904   ;;  %vm141_vm7 = vcmask 130048   ;;  %vm1081_vm8 = vcmask 64512  }
   0x3   :  { %v138_v5 = vld [vmem:[%s2821_s2] sm:$0xff]  ;;  %2209 = vmatprep.mubr.msk.f32.mxu0 %vm49_vm1, %v38_v4  ;;  %v39_v9 = vld [vmem:[%s2820_s0 + $0x8] sm:$0xff]  ;;  %vm1253_vm9 = vcmask 261120   ;;  %s2514_s1 = smov 104   ;;  %vm1359_vm10 = vcmask 58368  }
   0x4   :  { %2329 = vmatprep.subr.msk.bf16.mxu0 %vm2328_vm3, %v2327_v3  ;;  %v2594_v8 = vpack.c.bf16 %v139_v7, %v138_v5  ;;  %v2100_v10 = vld [vmem:[%s2822_s3] ss:$0 sm:$0xff]  ;;  %s2509_s3 = smov 16  }
   0x5   :  { %2332 = vmatpush3.bf16.msk.msra.mxu0 %vm2328_vm3, %v2327_v3 }
   0x6   :  { %2335 = vmatpush3.bf16.msra.mxu1 %v2594_v8  ;;  %2336 = vmatprep.subr.bf16.mxu0 %v2505_v2 }
   0x7   :  { %2339 = vmatprep.subr.bf16.mxu1 %v2505_v2 }
   0x8   :  { %2210 = vmatmul.mubr.msk.f32.vlgmr.msra.gmra.mrb[0].mxu0 %vm49_vm1, %v39_v9 }
   0x9   :  { %2217 = vmatmul.mubr.f32.vlgmr.msra.gmra.mrb[0].mxu1 %v2507_v6  ;;  %2338 = vmatpush3.bf16.msra.mxu0 %v2594_v8 }
   0xa   :  { %2223 = vmatprep.mubr.msk.f32.mxu0 %vm2506_vm4, %v2507_v6  ;;  %2341 = vmatpush3.bf16.msra.mxu1 %v2594_v8 }
   0xb   :  { %2230 = vmatprep.mubr.msk.f32.mxu1 %vm2506_vm4, %v2507_v6  ;;  %2342 = vmatprep.subr.bf16.mxu0 %v2505_v2 }
   0xc   :  { %2345 = vmatprep.subr.bf16.mxu1 %v2505_v2 }
  0xdb   :  { %v2211_v11 = vpop.f32.mrb[0].mxu0 }
  0xdc   :  { %v132_v12 = vadd.f32 %v2211_v11, %v2100_v10  ;;  %v126_v13 = vpop.f32.mrb[1].mxu0  ;;  %v211_v14 = vpop.f32.mrb[0].mxu1 }
  0xdd   :  { %v127_v15 = vadd.f32 %v2100_v10, %v126_v13  ;;  %v2218_v16 = vpop.f32.mrb[1].mxu1 }
  0xde   :  { %137 = vst.msk [vmem:[#allocation2 + $0x8] sm:$0xff] %vm135_vm5, %v132_v12 }
  0xdf   :  { %136 = vst.msk [vmem:[#allocation2] sm:$0xff] %vm135_vm5, %v127_v15 }
  0xe6   :  { %v140_v17 = vld [vmem:[#allocation2] sm:$0x3]  ;;  %v247_v33 = vld [vmem:[#allocation2 + $0x2] sm:$0x3]  ;;  %v352_v51 = vld [vmem:[#allocation2 + $0x4] sm:$0x3] }
  0xe7   :  { %v215_v18 = vadd.f32 %v211_v14, %v140_v17  ;;  %v457_v7 = vld [vmem:[#allocation2 + $0x6] sm:$0x3] }
  0xe9   :  { %2376 = vtanh.f32 %v215_v18  ;;  %v2104_v20 = vmul.f32 -1.442695, %v215_v18 }
  0xeb   :  { %2378 = vpow2.f32 %v2104_v20 }
  0xf3   :  { %v2377_v19 = vpop.eup %2376 }
  0xf4   :  { %225 = vrot.lane.b32.xlu0 %v2377_v19, %s2508_s28 }
  0xf5   :  { %v2379_v21 = vpop.eup %2378 }
  0xf6   :  { %v219_v22 = vadd.f32 1.0, %v2379_v21 }
  0xf8   :  { %2380 = vrcp.f32 %v219_v22 }
 0x102   :  { %v2381_v23 = vpop.eup %2380 }
 0x103   :  { %v223_v26 = vmul.f32 0.0, %v2381_v23 }
 0x166   :  { %v226_v24 = vpop.permute.xlu0 %225 }
 0x167   :  { %v228_v25 = vmul.f32 %v2381_v23, %v226_v24 }
 0x169   :  { %230 = vrot.lane.b32.xlu0 %v228_v25, %s2509_s3  ;;  %v562_v25 = vld [vmem:[#allocation2 + $0x8] sm:$0x3] }
 0x1db   :  { %v231_v27 = vpop.permute.xlu0 %230 }
 0x1dc   :  { %v233_v28 = vadd.f32 %v231_v27, %v223_v26 }
 0x1de   :  { %2382 = vtanh.f32 %v233_v28 }
 0x1e8   :  { %v2383_v29 = vpop.eup %2382 }
 0x1e9   :  { %236 = vrot.lane.b32.xlu1 %v2383_v29, %s2510_s29 }
 0x25b   :  { %v237_v30 = vpop.permute.xlu1 %236 }
 0x25c   :  { %v239_v31 = vmul.f32 %v2381_v23, %v237_v30 }
 0x25e   :  { %241 = vrot.lane.b32.xlu1 %v239_v31, %s2511_s30 }
 0x2d0   :  { %v242_v32 = vpop.permute.xlu1 %241 }
 0x2d1   :  { %245 = vst.msk [vmem:[#allocation3] sm:$0x3] %vm244_vm6, %v242_v32  ;;  %2224 = vmatmul.mubr.msk.f32.vlgmr.msra.gmra.mrb[2].mxu0 %vm141_vm7, %v242_v32 }
 0x2d2   :  { %2344 = vmatpush3.bf16.msra.mxu0 %v2594_v8  ;;  %2237 = vmatprep.mubr.msk.f32.mxu0 %vm2506_vm4, %v2507_v6 }
 0x2d3   :  { %2348 = vmatprep.subr.bf16.mxu0 %v2505_v2 }
 0x3a4   :  { %v316_v34 = vpop.f32.mrb[2].mxu0 }
 0x3a5   :  { %v320_v35 = vadd.f32 %v316_v34, %v247_v33  ;;  %v2225_v36 = vpop.f32.mrb[3].mxu0 }
 0x3a7   :  { %2384 = vtanh.f32 %v320_v35  ;;  %v2106_v38 = vmul.f32 -1.442695, %v320_v35 }
 0x3a9   :  { %2386 = vpow2.f32 %v2106_v38 }
 0x3b1   :  { %v2385_v37 = vpop.eup %2384 }
 0x3b2   :  { %330 = vrot.lane.b32.xlu0 %v2385_v37, %s2508_s28 }
 0x3b3   :  { %v2387_v39 = vpop.eup %2386 }
 0x3b4   :  { %v324_v40 = vadd.f32 1.0, %v2387_v39 }
 0x3b6   :  { %2388 = vrcp.f32 %v324_v40 }
 0x3c0   :  { %v2389_v41 = vpop.eup %2388 }
 0x3c1   :  { %v328_v44 = vmul.f32 %v2389_v41, %v233_v28 }
 0x424   :  { %v331_v42 = vpop.permute.xlu0 %330 }
 0x425   :  { %v333_v43 = vmul.f32 %v2389_v41, %v331_v42 }
 0x427   :  { %335 = vrot.lane.b32.xlu1 %v333_v43, %s2509_s3  ;;  %v667_v43 = vld [vmem:[#allocation2 + $0xa] sm:$0x3] }
 0x499   :  { %v336_v45 = vpop.permute.xlu1 %335 }
 0x49a   :  { %v338_v46 = vadd.f32 %v336_v45, %v328_v44 }
 0x49c   :  { %2390 = vtanh.f32 %v338_v46 }
 0x4a6   :  { %v2391_v47 = vpop.eup %2390 }
 0x4a7   :  { %341 = vrot.lane.b32.xlu0 %v2391_v47, %s2510_s29 }
 0x519   :  { %v342_v48 = vpop.permute.xlu0 %341 }
 0x51a   :  { %v344_v49 = vmul.f32 %v2389_v41, %v342_v48 }
 0x51c   :  { %346 = vrot.lane.b32.xlu1 %v344_v49, %s2511_s30 }
 0x58e   :  { %v347_v50 = vpop.permute.xlu1 %346 }
 0x58f   :  { %350 = vst.msk [vmem:[#allocation3 + $0x2] sm:$0x3] %vm244_vm6, %v347_v50  ;;  %2231 = vmatmul.mubr.msk.f32.vlgmr.msra.gmra.mrb[2].mxu1 %vm141_vm7, %v347_v50 }
 0x590   :  { %2347 = vmatpush3.bf16.msra.mxu1 %v2594_v8  ;;  %2244 = vmatprep.mubr.msk.f32.mxu1 %vm2506_vm4, %v2507_v6 }
 0x591   :  { %2351 = vmatprep.subr.bf16.mxu1 %v2505_v2 }
 0x662   :  { %v421_v52 = vpop.f32.mrb[2].mxu1 }
 0x663   :  { %v425_v53 = vadd.f32 %v421_v52, %v352_v51  ;;  %v2232_v54 = vpop.f32.mrb[3].mxu1 }
 0x665   :  { %2392 = vtanh.f32 %v425_v53  ;;  %v2108_v56 = vmul.f32 -1.442695, %v425_v53 }
 0x667   :  { %2394 = vpow2.f32 %v2108_v56 }
 0x66f   :  { %v2393_v55 = vpop.eup %2392 }
 0x670   :  { %435 = vrot.lane.b32.xlu0 %v2393_v55, %s2508_s28 }
 0x671   :  { %v2395_v57 = vpop.eup %2394 }
 0x672   :  { %v429_v58 = vadd.f32 1.0, %v2395_v57 }
 0x674   :  { %2396 = vrcp.f32 %v429_v58 }
 0x67e   :  { %v2397_v59 = vpop.eup %2396 }
 0x67f   :  { %v433_v62 = vmul.f32 %v2397_v59, %v338_v46 }
 0x6e2   :  { %v436_v60 = vpop.permute.xlu0 %435 }
 0x6e3   :  { %v438_v61 = vmul.f32 %v2397_v59, %v436_v60 }
 0x6e5   :  { %440 = vrot.lane.b32.xlu1 %v438_v61, %s2509_s3  ;;  %v772_v61 = vld [vmem:[#allocation2 + $0xc] sm:$0x3] }
 0x757   :  { %v441_v63 = vpop.permute.xlu1 %440 }
 0x758   :  { %v443_v0 = vadd.f32 %v441_v63, %v433_v62 }
 0x75a   :  { %2398 = vtanh.f32 %v443_v0 }
 0x764   :  { %v2399_v1 = vpop.eup %2398 }
 0x765   :  { %446 = vrot.lane.b32.xlu0 %v2399_v1, %s2510_s29 }
 0x7d7   :  { %v447_v3 = vpop.permute.xlu0 %446 }
 0x7d8   :  { %v449_v4 = vmul.f32 %v2397_v59, %v447_v3 }
 0x7da   :  { %451 = vrot.lane.b32.xlu1 %v449_v4, %s2511_s30 }
 0x84c   :  { %v452_v5 = vpop.permute.xlu1 %451 }
 0x84d   :  { %455 = vst.msk [vmem:[#allocation3 + $0x4] sm:$0x3] %vm244_vm6, %v452_v5  ;;  %2238 = vmatmul.mubr.msk.f32.vlgmr.msra.gmra.mrb[4].mxu0 %vm141_vm7, %v452_v5 }
 0x84e   :  { %2350 = vmatpush3.bf16.msra.mxu0 %v2594_v8  ;;  %2251 = vmatprep.mubr.msk.f32.mxu0 %vm2506_vm4, %v2507_v6 }
 0x84f   :  { %2354 = vmatprep.subr.bf16.mxu0 %v2505_v2 }
 0x920   :  { %v526_v9 = vpop.f32.mrb[4].mxu0 }
 0x921   :  { %v530_v10 = vadd.f32 %v526_v9, %v457_v7  ;;  %v2239_v11 = vpop.f32.mrb[5].mxu0 }
 0x923   :  { %2400 = vtanh.f32 %v530_v10  ;;  %v2110_v13 = vmul.f32 -1.442695, %v530_v10 }
 0x925   :  { %2402 = vpow2.f32 %v2110_v13 }
 0x92d   :  { %v2401_v12 = vpop.eup %2400 }
 0x92e   :  { %540 = vrot.lane.b32.xlu0 %v2401_v12, %s2508_s28 }
 0x92f   :  { %v2403_v14 = vpop.eup %2402 }
 0x930   :  { %v534_v15 = vadd.f32 1.0, %v2403_v14 }
 0x932   :  { %2404 = vrcp.f32 %v534_v15 }
 0x93c   :  { %v2405_v16 = vpop.eup %2404 }
 0x93d   :  { %v538_v19 = vmul.f32 %v2405_v16, %v443_v0 }
 0x9a0   :  { %v541_v17 = vpop.permute.xlu0 %540 }
 0x9a1   :  { %v543_v18 = vmul.f32 %v2405_v16, %v541_v17 }
 0x9a3   :  { %545 = vrot.lane.b32.xlu1 %v543_v18, %s2509_s3  ;;  %v877_v18 = vld [vmem:[#allocation2 + $0xe] sm:$0x3] }
 0xa15   :  { %v546_v2 = vpop.permute.xlu1 %545 }
 0xa16   :  { %v548_v20 = vadd.f32 %v546_v2, %v538_v19 }
 0xa18   :  { %2406 = vtanh.f32 %v548_v20 }
 0xa22   :  { %v2407_v21 = vpop.eup %2406 }
 0xa23   :  { %551 = vrot.lane.b32.xlu0 %v2407_v21, %s2510_s29 }
 0xa95   :  { %v552_v22 = vpop.permute.xlu0 %551 }
 0xa96   :  { %v554_v23 = vmul.f32 %v2405_v16, %v552_v22 }
 0xa98   :  { %556 = vrot.lane.b32.xlu1 %v554_v23, %s2511_s30 }
 0xb0a   :  { %v557_v24 = vpop.permute.xlu1 %556 }
 0xb0b   :  { %560 = vst.msk [vmem:[#allocation3 + $0x6] sm:$0x3] %vm244_vm6, %v557_v24  ;;  %2245 = vmatmul.mubr.msk.f32.vlgmr.msra.gmra.mrb[4].mxu1 %vm141_vm7, %v557_v24 }
 0xb0c   :  { %2353 = vmatpush3.bf16.msra.mxu1 %v2594_v8  ;;  %2258 = vmatprep.mubr.msk.f32.mxu1 %vm2506_vm4, %v2507_v6 }
 0xb12   :  { %v981_v60 = vld [vmem:[#allocation3] sm:$0xff] }
 0xbde   :  { %v631_v26 = vpop.f32.mrb[4].mxu1 }
 0xbdf   :  { %v635_v27 = vadd.f32 %v631_v26, %v562_v25  ;;  %v2246_v28 = vpop.f32.mrb[5].mxu1 }
 0xbe1   :  { %2408 = vtanh.f32 %v635_v27  ;;  %v2112_v30 = vmul.f32 -1.442695, %v635_v27 }
 0xbe3   :  { %2410 = vpow2.f32 %v2112_v30 }
 0xbeb   :  { %v2409_v29 = vpop.eup %2408 }
 0xbec   :  { %645 = vrot.lane.b32.xlu0 %v2409_v29, %s2508_s28 }
 0xbed   :  { %v2411_v31 = vpop.eup %2410 }
 0xbee   :  { %v639_v32 = vadd.f32 1.0, %v2411_v31 }
 0xbf0   :  { %2412 = vrcp.f32 %v639_v32  ;;  %v983_v32 = vld [vmem:[%s2823_s4] sm:$0xff] }
 0xbfa   :  { %v2413_v33 = vpop.eup %2412 }
 0xbfb   :  { %v643_v36 = vmul.f32 %v2413_v33, %v548_v20 }
 0xc5e   :  { %v646_v34 = vpop.permute.xlu0 %645 }
 0xc5f   :  { %v648_v35 = vmul.f32 %v2413_v33, %v646_v34 }
 0xc61   :  { %650 = vrot.lane.b32.xlu1 %v648_v35, %s2509_s3 }
 0xcd3   :  { %v651_v37 = vpop.permute.xlu1 %650 }
 0xcd4   :  { %v653_v38 = vadd.f32 %v651_v37, %v643_v36 }
 0xcd6   :  { %2414 = vtanh.f32 %v653_v38 }
 0xce0   :  { %v2415_v39 = vpop.eup %2414 }
 0xce1   :  { %656 = vrot.lane.b32.xlu0 %v2415_v39, %s2510_s29  ;;  %v1073_v39 = vld [vmem:[%s2824_s6] sm:$0xff] }
 0xd53   :  { %v657_v40 = vpop.permute.xlu0 %656 }
 0xd54   :  { %v659_v41 = vmul.f32 %v2413_v33, %v657_v40  ;;  %v984_v33 = vld [vmem:[%s2823_s4 + $0x8] sm:$0xff]  ;;  %v2119_v40 = vld [vmem:[%s2825_s5] ss:$0 sm:$0xff] }
 0xd55   :  { %v2357_v34 = vpack.c.bf16 %v984_v33, %v983_v32 }
 0xd56   :  { %661 = vrot.lane.b32.xlu1 %v659_v41, %s2511_s30 }
 0xd57   :  { %2358 = vmatprep.subr.bf16.mxu1 %v2357_v34 }
 0xdc8   :  { %v662_v42 = vpop.permute.xlu1 %661 }
 0xdc9   :  { %665 = vst.msk [vmem:[#allocation3 + $0x8] sm:$0x3] %vm244_vm6, %v662_v42  ;;  %2252 = vmatmul.mubr.msk.f32.vlgmr.msra.gmra.mrb[6].mxu0 %vm141_vm7, %v662_v42 }
 0xdca   :  { %2356 = vmatpush3.bf16.msra.mxu0 %v2594_v8  ;;  %2265 = vmatprep.mubr.msk.f32.mxu0 %vm2506_vm4, %v2507_v6 }
 0xdcb   :  { %2275 = vmatprep.subr.mxu0 %v1073_v39 }
 0xe9c   :  { %v736_v44 = vpop.f32.mrb[6].mxu0 }
 0xe9d   :  { %v740_v45 = vadd.f32 %v736_v44, %v667_v43  ;;  %v2253_v46 = vpop.f32.mrb[7].mxu0 }
 0xe9e   :  { %v1164_v46 = vld [vmem:[%s2826_s8 + $0x8] sm:$0xff] }
 0xe9f   :  { %2416 = vtanh.f32 %v740_v45  ;;  %v2114_v48 = vmul.f32 -1.442695, %v740_v45  ;;  %v1163_v45 = vld [vmem:[%s2826_s8] sm:$0xff] }
 0xea1   :  { %2418 = vpow2.f32 %v2114_v48  ;;  %v2709_v48 = vld [vmem:[%s2827_s9] sm:$0xff] }
 0xea9   :  { %v2417_v47 = vpop.eup %2416 }
 0xeaa   :  { %750 = vrot.lane.b32.xlu0 %v2417_v47, %s2508_s28  ;;  %v2361_v47 = vpack.c.bf16 %v1164_v46, %v1163_v45 }
 0xeab   :  { %v2419_v49 = vpop.eup %2418 }
 0xeac   :  { %v744_v50 = vadd.f32 1.0, %v2419_v49  ;;  %v2122_v49 = vld [vmem:[%s2828_s7] ss:$0 sm:$0xff]  ;;  %s2512_s7 = smov 112  }
 0xeae   :  { %2420 = vrcp.f32 %v744_v50 }
 0xeb8   :  { %v2421_v51 = vpop.eup %2420 }
 0xeb9   :  { %v748_v8 = vmul.f32 %v2421_v51, %v653_v38 }
 0xf1c   :  { %v751_v52 = vpop.permute.xlu0 %750 }
 0xf1d   :  { %v753_v53 = vmul.f32 %v2421_v51, %v751_v52 }
 0xf1f   :  { %755 = vrot.lane.b32.xlu1 %v753_v53, %s2509_s3 }
 0xf91   :  { %v756_v54 = vpop.permute.xlu1 %755 }
 0xf92   :  { %v758_v55 = vadd.f32 %v756_v54, %v748_v8 }
 0xf94   :  { %2422 = vtanh.f32 %v758_v55 }
 0xf9e   :  { %v2423_v56 = vpop.eup %2422 }
 0xf9f   :  { %761 = vrot.lane.b32.xlu0 %v2423_v56, %s2510_s29 }
0x1011   :  { %v762_v57 = vpop.permute.xlu0 %761 }
0x1012   :  { %v764_v58 = vmul.f32 %v2421_v51, %v762_v57 }
0x1014   :  { %766 = vrot.lane.b32.xlu1 %v764_v58, %s2511_s30 }
0x1086   :  { %v767_v59 = vpop.permute.xlu1 %766 }
0x1087   :  { %770 = vst.msk [vmem:[#allocation3 + $0xa] sm:$0x3] %vm244_vm6, %v767_v59  ;;  %2259 = vmatmul.mubr.msk.f32.vlgmr.msra.gmra.mrb[6].mxu1 %vm141_vm7, %v767_v59 }
0x1088   :  { %2272 = vmatprep.mubr.msk.f32.mxu1 %vm141_vm7, %v981_v60  ;;  %2360 = vmatpush3.bf16.msra.mxu1 %v2357_v34 }
0x1089   :  { %2362 = vmatprep.subr.bf16.mxu1 %v2361_v47 }
0x115a   :  { %v841_v62 = vpop.f32.mrb[6].mxu1 }
0x115b   :  { %v845_v63 = vadd.f32 %v841_v62, %v772_v61  ;;  %v2260_v0 = vpop.f32.mrb[7].mxu1 }
0x115d   :  { %2424 = vtanh.f32 %v845_v63  ;;  %v2116_v3 = vmul.f32 -1.442695, %v845_v63 }
0x115f   :  { %2426 = vpow2.f32 %v2116_v3 }
0x1167   :  { %v2425_v1 = vpop.eup %2424 }
0x1168   :  { %855 = vrot.lane.b32.xlu0 %v2425_v1, %s2508_s28 }
0x1169   :  { %v2427_v4 = vpop.eup %2426 }
0x116a   :  { %v849_v5 = vadd.f32 1.0, %v2427_v4 }
0x116c   :  { %2428 = vrcp.f32 %v849_v5 }
0x1176   :  { %v2429_v7 = vpop.eup %2428 }
0x1177   :  { %v853_v11 = vmul.f32 %v2429_v7, %v758_v55  ;;  %v2125_v55 = vld [vmem:[%s2829_s10] ss:$0 sm:$0xff]  ;;  %s2513_s10 = smov 8  }
0x11da   :  { %v856_v9 = vpop.permute.xlu0 %855 }
0x11db   :  { %v858_v10 = vmul.f32 %v2429_v7, %v856_v9 }
0x11dd   :  { %860 = vrot.lane.b32.xlu1 %v858_v10, %s2509_s3 }
0x124f   :  { %v861_v12 = vpop.permute.xlu1 %860 }
0x1250   :  { %v863_v13 = vadd.f32 %v861_v12, %v853_v11 }
0x1252   :  { %2430 = vtanh.f32 %v863_v13 }
0x125c   :  { %v2431_v14 = vpop.eup %2430 }
0x125d   :  { %866 = vrot.lane.b32.xlu0 %v2431_v14, %s2510_s29 }
0x12cf   :  { %v867_v15 = vpop.permute.xlu0 %866 }
0x12d0   :  { %v869_v16 = vmul.f32 %v2429_v7, %v867_v15 }
0x12d2   :  { %871 = vrot.lane.b32.xlu1 %v869_v16, %s2511_s30 }
0x1344   :  { %v872_v17 = vpop.permute.xlu1 %871 }
0x1345   :  { %875 = vst.msk [vmem:[#allocation3 + $0xc] sm:$0x3] %vm244_vm6, %v872_v17  ;;  %2266 = vmatmul.mubr.msk.f32.vlgmr.msra.gmra.mrb[8].mxu0 %vm141_vm7, %v872_v17 }
0x1346   :  { %2276 = vmatpush3.msra.mxu0 %v1073_v39 }
0x1347   :  { %2287 = vmatprep.subr.mxu0 %v2507_v6 }
0x1418   :  { %v946_v19 = vpop.f32.mrb[8].mxu0 }
0x1419   :  { %v950_v2 = vadd.f32 %v946_v19, %v877_v18  ;;  %v2267_v20 = vpop.f32.mrb[9].mxu0 }
0x141b   :  { %2432 = vtanh.f32 %v950_v2  ;;  %v2118_v22 = vmul.f32 -1.442695, %v950_v2 }
0x141d   :  { %2434 = vpow2.f32 %v2118_v22 }
0x1425   :  { %v2433_v21 = vpop.eup %2432 }
0x1426   :  { %960 = vrot.lane.b32.xlu0 %v2433_v21, %s2508_s28 }
0x1427   :  { %v2435_v23 = vpop.eup %2434 }
0x1428   :  { %v954_v24 = vadd.f32 1.0, %v2435_v23 }
0x142a   :  { %2436 = vrcp.f32 %v954_v24 }
0x1434   :  { %v2437_v25 = vpop.eup %2436 }
0x1435   :  { %v958_v28 = vmul.f32 %v2437_v25, %v863_v13 }
0x1498   :  { %v961_v26 = vpop.permute.xlu0 %960 }
0x1499   :  { %v963_v27 = vmul.f32 %v2437_v25, %v961_v26 }
0x149b   :  { %965 = vrot.lane.b32.xlu1 %v963_v27, %s2509_s3 }
0x150d   :  { %v966_v29 = vpop.permute.xlu1 %965 }
0x150e   :  { %v968_v30 = vadd.f32 %v966_v29, %v958_v28 }
0x1510   :  { %2438 = vtanh.f32 %v968_v30 }
0x151a   :  { %v2439_v31 = vpop.eup %2438 }
0x151b   :  { %971 = vrot.lane.b32.xlu0 %v2439_v31, %s2510_s29 }
0x158d   :  { %v972_v35 = vpop.permute.xlu0 %971 }
0x158e   :  { %v974_v36 = vmul.f32 %v2437_v25, %v972_v35 }
0x1590   :  { %976 = vrot.lane.b32.xlu1 %v974_v36, %s2511_s30 }
0x1602   :  { %v977_v37 = vpop.permute.xlu1 %976 }
0x1603   :  { %980 = vst.msk [vmem:[#allocation3 + $0xe] sm:$0x3] %vm244_vm6, %v977_v37 }
0x160a   :  { %v982_v38 = vld [vmem:[#allocation3 + $0x8] sm:$0xff] }
0x160b   :  { %2273 = vmatmul.mubr.msk.f32.vlgmr.msra.gmra.mrb[8].mxu1 %vm141_vm7, %v982_v38 }
0x160c   :  { %2364 = vmatpush3.bf16.msra.mxu1 %v2361_v47 }
0x160d   :  { %2292 = vmatprep.subr.mxu1 %v2507_v6 }
0x16de   :  { %v2274_v41 = vpop.f32.mrb[8].mxu1 }
0x16df   :  { %v1064_v42 = vpop.f32.mrb[9].mxu1  ;;  %v1070_v44 = vadd.f32 %v2274_v41, %v2119_v40 }
0x16e0   :  { %v1065_v43 = vadd.f32 %v2119_v40, %v1064_v42 }
0x16e2   :  { %2277 = vmatprep.mubr.msk.f32.mxu0 %vm1081_vm8, %v1065_v43 }
0x16e3   :  { %2278 = vmatmul.mubr.msk.f32.vlgmr.msra.gmra.mrb[10].mxu0 %vm1081_vm8, %v1070_v44 }
0x16e4   :  { %2289 = vmatprep.mubr.msk.f32.mxu0 %vm2506_vm4, %v2507_v6  ;;  %2288 = vmatpush3.msra.mxu0 %v2709_v48 }
0x16e5   :  { %2297 = vmatprep.subr.mxu0 %v2507_v6 }
0x16e7   :  { %2290 = vmatmul.mubr.f32.vlgmr.msra.gmra.mrb[12].mxu0 %v2507_v6 }
0x16e8   :  { %2298 = vmatpush3.msra.mxu0 %v2709_v48  ;;  %2299 = vmatprep.mubr.msk.f32.mxu0 %vm2506_vm4, %v2507_v6 }
0x16e9   :  { %2307 = vmatprep.subr.mxu0 %v2507_v6 }
0x17b6   :  { %v2279_v50 = vpop.f32.mrb[10].mxu0 }
0x17b7   :  { %v1154_v51 = vpop.f32.mrb[11].mxu0  ;;  %v1160_v53 = vadd.f32 %v2279_v50, %v2122_v49 }
0x17b8   :  { %v1155_v52 = vadd.f32 %v2122_v49, %v1154_v51 }
0x17ba   :  { %2284 = vmatprep.mubr.msk.f32.mxu1 %vm141_vm7, %v1155_v52  ;;  %v1326_v8 = vpop.f32.mrb[12].mxu0 }
0x17bb   :  { %2285 = vmatmul.mubr.msk.f32.vlgmr.msra.gmra.mrb[10].mxu1 %vm141_vm7, %v1160_v53  ;;  %v2291_v54 = vpop.f32.mrb[13].mxu0 }
0x17bc   :  { %2293 = vmatpush3.msra.mxu1 %v2709_v48  ;;  %2294 = vmatprep.mubr.msk.f32.mxu1 %vm2506_vm4, %v2507_v6 }
0x17bd   :  { %2302 = vmatprep.subr.mxu1 %v2507_v6 }
0x188e   :  { %v2286_v56 = vpop.f32.mrb[10].mxu1 }
0x188f   :  { %v1250_v57 = vadd.f32 %v2286_v56, %v2125_v55  ;;  %v1244_v58 = vpop.f32.mrb[11].mxu1 }
0x1890   :  { %v1245_v59 = vadd.f32 %v2125_v55, %v1244_v58 }
0x1891   :  { %1255 = vst.msk [vmem:[#allocation4 + $0x8] sm:$0xff] %vm1253_vm9, %v1250_v57 }
0x1892   :  { %1254 = vst.msk [vmem:[#allocation4] sm:$0xff] %vm1253_vm9, %v1245_v59 }
0x1899   :  { %v1257_v60 = vld [vmem:[#allocation4] sm:$0x3]  ;;  %v1362_v15 = vld [vmem:[#allocation4 + $0x2] sm:$0x3]  ;;  %v1467_v32 = vld [vmem:[#allocation4 + $0x4] sm:$0x3] }
0x189a   :  { %v1330_v61 = vadd.f32 %v1326_v8, %v1257_v60  ;;  %v1572_v51 = vld [vmem:[#allocation4 + $0x6] sm:$0x3] }
0x189c   :  { %2440 = vtanh.f32 %v1330_v61  ;;  %v2128_v63 = vmul.f32 -1.442695, %v1330_v61 }
0x189e   :  { %2442 = vpow2.f32 %v2128_v63 }
0x18a6   :  { %v2441_v62 = vpop.eup %2440 }
0x18a7   :  { %1340 = vrot.lane.b32.xlu0 %v2441_v62, %s2512_s7 }
0x18a8   :  { %v2443_v0 = vpop.eup %2442 }
0x18a9   :  { %v1334_v1 = vadd.f32 1.0, %v2443_v0 }
0x18ab   :  { %2444 = vrcp.f32 %v1334_v1 }
0x18b5   :  { %v2445_v3 = vpop.eup %2444 }
0x18b6   :  { %v1338_v7 = vmul.f32 0.0, %v2445_v3 }
0x1919   :  { %v1341_v4 = vpop.permute.xlu0 %1340 }
0x191a   :  { %v1343_v5 = vmul.f32 %v2445_v3, %v1341_v4 }
0x191c   :  { %1345 = vrot.lane.b32.xlu1 %v1343_v5, %s2513_s10  ;;  %v1677_v5 = vld [vmem:[#allocation4 + $0x8] sm:$0x3] }
0x198e   :  { %v1346_v9 = vpop.permute.xlu1 %1345 }
0x198f   :  { %v1348_v10 = vadd.f32 %v1346_v9, %v1338_v7 }
0x1991   :  { %2446 = vtanh.f32 %v1348_v10 }
0x199b   :  { %v2447_v11 = vpop.eup %2446 }
0x199c   :  { %1351 = vrot.lane.b32.xlu0 %v2447_v11, %s2509_s3 }
0x1a0e   :  { %v1352_v12 = vpop.permute.xlu0 %1351 }
0x1a0f   :  { %v1354_v13 = vmul.f32 %v2445_v3, %v1352_v12 }
0x1a11   :  { %1356 = vrot.lane.b32.xlu1 %v1354_v13, %s2514_s1 }
0x1a83   :  { %v1357_v14 = vpop.permute.xlu1 %1356 }
0x1a84   :  { %1360 = vst.msk [vmem:[%s2830_s11] sm:$0x3] %vm1359_vm10, %v1357_v14  ;;  %2295 = vmatmul.mubr.msk.f32.vlgmr.msra.gmra.mrb[12].mxu1 %vm1081_vm8, %v1357_v14 }
0x1a85   :  { %2303 = vmatpush3.msra.mxu1 %v2709_v48  ;;  %2304 = vmatprep.mubr.msk.f32.mxu1 %vm2506_vm4, %v2507_v6 }
0x1a86   :  { %2312 = vmatprep.subr.mxu1 %v2507_v6 }
0x1b57   :  { %v1431_v16 = vpop.f32.mrb[12].mxu1 }
0x1b58   :  { %v1435_v17 = vadd.f32 %v1431_v16, %v1362_v15  ;;  %v2296_v18 = vpop.f32.mrb[13].mxu1 }
0x1b5a   :  { %2448 = vtanh.f32 %v1435_v17  ;;  %v2130_v2 = vmul.f32 -1.442695, %v1435_v17 }
0x1b5c   :  { %2450 = vpow2.f32 %v2130_v2 }
0x1b64   :  { %v2449_v19 = vpop.eup %2448 }
0x1b65   :  { %1445 = vrot.lane.b32.xlu0 %v2449_v19, %s2512_s7 }
0x1b66   :  { %v2451_v20 = vpop.eup %2450 }
0x1b67   :  { %v1439_v21 = vadd.f32 1.0, %v2451_v20 }
0x1b69   :  { %2452 = vrcp.f32 %v1439_v21 }
0x1b73   :  { %v2453_v22 = vpop.eup %2452 }
0x1b74   :  { %v1443_v25 = vmul.f32 %v2453_v22, %v1348_v10 }
0x1bd7   :  { %v1446_v23 = vpop.permute.xlu0 %1445 }
0x1bd8   :  { %v1448_v24 = vmul.f32 %v2453_v22, %v1446_v23 }
0x1bda   :  { %1450 = vrot.lane.b32.xlu1 %v1448_v24, %s2513_s10  ;;  %v1782_v24 = vld [vmem:[#allocation4 + $0xa] sm:$0x3] }
0x1c4c   :  { %v1451_v26 = vpop.permute.xlu1 %1450 }
0x1c4d   :  { %v1453_v27 = vadd.f32 %v1451_v26, %v1443_v25 }
0x1c4f   :  { %2454 = vtanh.f32 %v1453_v27 }
0x1c59   :  { %v2455_v28 = vpop.eup %2454 }
0x1c5a   :  { %1456 = vrot.lane.b32.xlu0 %v2455_v28, %s2509_s3 }
0x1ccc   :  { %v1457_v29 = vpop.permute.xlu0 %1456 }
0x1ccd   :  { %v1459_v30 = vmul.f32 %v2453_v22, %v1457_v29 }
0x1ccf   :  { %1461 = vrot.lane.b32.xlu1 %v1459_v30, %s2514_s1 }
0x1d41   :  { %v1462_v31 = vpop.permute.xlu1 %1461 }
0x1d42   :  { %2131 = vst.msk [vmem:[%s2830_s11 + $0x2] sm:$0x3] %vm1359_vm10, %v1462_v31  ;;  %2300 = vmatmul.mubr.msk.f32.vlgmr.msra.gmra.mrb[14].mxu0 %vm1081_vm8, %v1462_v31 }
0x1d43   :  { %2308 = vmatpush3.msra.mxu0 %v2709_v48  ;;  %2309 = vmatprep.mubr.msk.f32.mxu0 %vm2506_vm4, %v2507_v6 }
0x1d44   :  { %2317 = vmatprep.subr.mxu0 %v2507_v6 }
0x1e15   :  { %v1536_v33 = vpop.f32.mrb[14].mxu0 }
0x1e16   :  { %v1540_v34 = vadd.f32 %v1536_v33, %v1467_v32  ;;  %v2301_v35 = vpop.f32.mrb[15].mxu0 }
0x1e18   :  { %2456 = vtanh.f32 %v1540_v34  ;;  %v2133_v37 = vmul.f32 -1.442695, %v1540_v34 }
0x1e1a   :  { %2458 = vpow2.f32 %v2133_v37 }
0x1e22   :  { %v2457_v36 = vpop.eup %2456 }
0x1e23   :  { %1550 = vrot.lane.b32.xlu0 %v2457_v36, %s2512_s7 }
0x1e24   :  { %v2459_v38 = vpop.eup %2458 }
0x1e25   :  { %v1544_v39 = vadd.f32 1.0, %v2459_v38 }
0x1e27   :  { %2460 = vrcp.f32 %v1544_v39 }
0x1e31   :  { %v2461_v40 = vpop.eup %2460 }
0x1e32   :  { %v1548_v43 = vmul.f32 %v2461_v40, %v1453_v27 }
0x1e95   :  { %v1551_v41 = vpop.permute.xlu0 %1550 }
0x1e96   :  { %v1553_v42 = vmul.f32 %v2461_v40, %v1551_v41 }
0x1e98   :  { %1555 = vrot.lane.b32.xlu1 %v1553_v42, %s2513_s10 }
0x1f0a   :  { %v1556_v44 = vpop.permute.xlu1 %1555 }
0x1f0b   :  { %v1558_v45 = vadd.f32 %v1556_v44, %v1548_v43 }
0x1f0d   :  { %2462 = vtanh.f32 %v1558_v45 }
0x1f17   :  { %v2463_v46 = vpop.eup %2462 }
0x1f18   :  { %1561 = vrot.lane.b32.xlu0 %v2463_v46, %s2509_s3 }
0x1f8a   :  { %v1562_v47 = vpop.permute.xlu0 %1561 }
0x1f8b   :  { %v1564_v49 = vmul.f32 %v2461_v40, %v1562_v47  ;;  %v1887_v40 = vld [vmem:[#allocation4 + $0xc] sm:$0x3] }
0x1f8d   :  { %1566 = vrot.lane.b32.xlu1 %v1564_v49, %s2514_s1 }
0x1fff   :  { %v1567_v50 = vpop.permute.xlu1 %1566 }
0x2000   :  { %2134 = vst.msk [vmem:[%s2830_s11 + $0x4] sm:$0x3] %vm1359_vm10, %v1567_v50  ;;  %2305 = vmatmul.mubr.msk.f32.vlgmr.msra.gmra.mrb[14].mxu1 %vm1081_vm8, %v1567_v50 }
0x2001   :  { %2313 = vmatpush3.msra.mxu1 %v2709_v48  ;;  %2314 = vmatprep.mubr.msk.f32.mxu1 %vm2506_vm4, %v2507_v6 }
0x2002   :  { %2322 = vmatprep.subr.mxu1 %v2507_v6 }
0x20d3   :  { %v1641_v52 = vpop.f32.mrb[14].mxu1 }
0x20d4   :  { %v1645_v53 = vadd.f32 %v1641_v52, %v1572_v51  ;;  %v2306_v8 = vpop.f32.mrb[15].mxu1 }
0x20d6   :  { %2464 = vtanh.f32 %v1645_v53  ;;  %v2136_v55 = vmul.f32 -1.442695, %v1645_v53 }
0x20d8   :  { %2466 = vpow2.f32 %v2136_v55 }
0x20e0   :  { %v2465_v54 = vpop.eup %2464 }
0x20e1   :  { %1655 = vrot.lane.b32.xlu0 %v2465_v54, %s2512_s7 }
0x20e2   :  { %v2467_v56 = vpop.eup %2466 }
0x20e3   :  { %v1649_v57 = vadd.f32 1.0, %v2467_v56 }
0x20e5   :  { %2468 = vrcp.f32 %v1649_v57 }
0x20ef   :  { %v2469_v58 = vpop.eup %2468 }
0x20f0   :  { %v1653_v61 = vmul.f32 %v2469_v58, %v1558_v45 }
0x2153   :  { %v1656_v59 = vpop.permute.xlu0 %1655 }
0x2154   :  { %v1658_v60 = vmul.f32 %v2469_v58, %v1656_v59 }
0x2156   :  { %1660 = vrot.lane.b32.xlu1 %v1658_v60, %s2513_s10 }
0x21c8   :  { %v1661_v62 = vpop.permute.xlu1 %1660 }
0x21c9   :  { %v1663_v63 = vadd.f32 %v1661_v62, %v1653_v61 }
0x21cb   :  { %2470 = vtanh.f32 %v1663_v63 }
0x21d5   :  { %v2471_v0 = vpop.eup %2470 }
0x21d6   :  { %1666 = vrot.lane.b32.xlu0 %v2471_v0, %s2509_s3 }
0x2248   :  { %v1667_v1 = vpop.permute.xlu0 %1666 }
0x2249   :  { %v1669_v3 = vmul.f32 %v2469_v58, %v1667_v1  ;;  %v1992_v58 = vld [vmem:[#allocation4 + $0xe] sm:$0x3] }
0x224b   :  { %1671 = vrot.lane.b32.xlu1 %v1669_v3, %s2514_s1 }
0x22bd   :  { %v1672_v4 = vpop.permute.xlu1 %1671 }
0x22be   :  { %2137 = vst.msk [vmem:[%s2830_s11 + $0x6] sm:$0x3] %vm1359_vm10, %v1672_v4  ;;  %2310 = vmatmul.mubr.msk.f32.vlgmr.msra.gmra.mrb[16].mxu0 %vm1081_vm8, %v1672_v4 }
0x22bf   :  { %2318 = vmatpush3.msra.mxu0 %v2709_v48  ;;  %2319 = vmatprep.mubr.msk.f32.mxu0 %vm2506_vm4, %v2507_v6 }
0x2391   :  { %v1746_v7 = vpop.f32.mrb[16].mxu0 }
0x2392   :  { %v1750_v9 = vadd.f32 %v1746_v7, %v1677_v5  ;;  %v2311_v10 = vpop.f32.mrb[17].mxu0 }
0x2394   :  { %2472 = vtanh.f32 %v1750_v9  ;;  %v2139_v12 = vmul.f32 -1.442695, %v1750_v9 }
0x2396   :  { %2474 = vpow2.f32 %v2139_v12 }
0x239e   :  { %v2473_v11 = vpop.eup %2472 }
0x239f   :  { %1760 = vrot.lane.b32.xlu0 %v2473_v11, %s2512_s7 }
0x23a0   :  { %v2475_v13 = vpop.eup %2474 }
0x23a1   :  { %v1754_v14 = vadd.f32 1.0, %v2475_v13 }
0x23a3   :  { %2476 = vrcp.f32 %v1754_v14 }
0x23ad   :  { %v2477_v15 = vpop.eup %2476 }
0x23ae   :  { %v1758_v18 = vmul.f32 %v2477_v15, %v1663_v63 }
0x2411   :  { %v1761_v16 = vpop.permute.xlu0 %1760 }
0x2412   :  { %v1763_v17 = vmul.f32 %v2477_v15, %v1761_v16 }
0x2414   :  { %1765 = vrot.lane.b32.xlu1 %v1763_v17, %s2513_s10 }
0x2486   :  { %v1766_v19 = vpop.permute.xlu1 %1765 }
0x2487   :  { %v1768_v2 = vadd.f32 %v1766_v19, %v1758_v18 }
0x2489   :  { %2478 = vtanh.f32 %v1768_v2 }
0x2493   :  { %v2479_v20 = vpop.eup %2478 }
0x2494   :  { %1771 = vrot.lane.b32.xlu0 %v2479_v20, %s2509_s3 }
0x2506   :  { %v1772_v21 = vpop.permute.xlu0 %1771 }
0x2507   :  { %v1774_v22 = vmul.f32 %v2477_v15, %v1772_v21 }
0x2509   :  { %1776 = vrot.lane.b32.xlu1 %v1774_v22, %s2514_s1 }
0x257b   :  { %v1777_v23 = vpop.permute.xlu1 %1776 }
0x257c   :  { %2140 = vst.msk [vmem:[%s2830_s11 + $0x8] sm:$0x3] %vm1359_vm10, %v1777_v23  ;;  %2315 = vmatmul.mubr.msk.f32.vlgmr.msra.gmra.mrb[16].mxu1 %vm1081_vm8, %v1777_v23 }
0x257d   :  { %2323 = vmatpush3.msra.mxu1 %v2709_v48  ;;  %2324 = vmatprep.mubr.msk.f32.mxu1 %vm2506_vm4, %v2507_v6 }
0x264f   :  { %v1851_v25 = vpop.f32.mrb[16].mxu1 }
0x2650   :  { %v1855_v26 = vadd.f32 %v1851_v25, %v1782_v24  ;;  %v2316_v27 = vpop.f32.mrb[17].mxu1 }
0x2652   :  { %2480 = vtanh.f32 %v1855_v26  ;;  %v2142_v29 = vmul.f32 -1.442695, %v1855_v26 }
0x2654   :  { %2482 = vpow2.f32 %v2142_v29 }
0x265c   :  { %v2481_v28 = vpop.eup %2480 }
0x265d   :  { %1865 = vrot.lane.b32.xlu0 %v2481_v28, %s2512_s7 }
0x265e   :  { %v2483_v30 = vpop.eup %2482 }
0x265f   :  { %v1859_v31 = vadd.f32 1.0, %v2483_v30 }
0x2661   :  { %2484 = vrcp.f32 %v1859_v31 }
0x266b   :  { %v2485_v32 = vpop.eup %2484 }
0x266c   :  { %v1863_v48 = vmul.f32 %v2485_v32, %v1768_v2 }
0x26cf   :  { %v1866_v33 = vpop.permute.xlu0 %1865 }
0x26d0   :  { %v1868_v34 = vmul.f32 %v2485_v32, %v1866_v33 }
0x26d2   :  { %1870 = vrot.lane.b32.xlu1 %v1868_v34, %s2513_s10 }
0x2744   :  { %v1871_v6 = vpop.permute.xlu1 %1870 }
0x2745   :  { %v1873_v35 = vadd.f32 %v1871_v6, %v1863_v48 }
0x2747   :  { %2486 = vtanh.f32 %v1873_v35 }
0x2751   :  { %v2487_v36 = vpop.eup %2486 }
0x2752   :  { %1876 = vrot.lane.b32.xlu0 %v2487_v36, %s2509_s3 }
0x27c4   :  { %v1877_v37 = vpop.permute.xlu0 %1876 }
0x27c5   :  { %v1879_v38 = vmul.f32 %v2485_v32, %v1877_v37 }
0x27c7   :  { %1881 = vrot.lane.b32.xlu1 %v1879_v38, %s2514_s1 }
0x2839   :  { %v1882_v39 = vpop.permute.xlu1 %1881 }
0x283a   :  { %2143 = vst.msk [vmem:[%s2830_s11 + $0xa] sm:$0x3] %vm1359_vm10, %v1882_v39  ;;  %2320 = vmatmul.mubr.msk.f32.vlgmr.msra.gmra.mrb[18].mxu0 %vm1081_vm8, %v1882_v39 }
0x290d   :  { %v1956_v41 = vpop.f32.mrb[18].mxu0 }
0x290e   :  { %v1960_v42 = vadd.f32 %v1956_v41, %v1887_v40  ;;  %v2321_v43 = vpop.f32.mrb[19].mxu0 }
0x2910   :  { %2488 = vtanh.f32 %v1960_v42  ;;  %v2145_v45 = vmul.f32 -1.442695, %v1960_v42 }
0x2912   :  { %2490 = vpow2.f32 %v2145_v45 }
0x291a   :  { %v2489_v44 = vpop.eup %2488 }
0x291b   :  { %1970 = vrot.lane.b32.xlu0 %v2489_v44, %s2512_s7 }
0x291c   :  { %v2491_v46 = vpop.eup %2490 }
0x291d   :  { %v1964_v47 = vadd.f32 1.0, %v2491_v46 }
0x291f   :  { %2492 = vrcp.f32 %v1964_v47 }
0x2929   :  { %v2493_v49 = vpop.eup %2492 }
0x292a   :  { %v1968_v52 = vmul.f32 %v2493_v49, %v1873_v35 }
0x298d   :  { %v1971_v50 = vpop.permute.xlu0 %1970 }
0x298e   :  { %v1973_v51 = vmul.f32 %v2493_v49, %v1971_v50 }
0x2990   :  { %1975 = vrot.lane.b32.xlu1 %v1973_v51, %s2513_s10 }
0x2a02   :  { %v1976_v53 = vpop.permute.xlu1 %1975 }
0x2a03   :  { %v1978_v8 = vadd.f32 %v1976_v53, %v1968_v52 }
0x2a05   :  { %2494 = vtanh.f32 %v1978_v8 }
0x2a0f   :  { %v2495_v54 = vpop.eup %2494 }
0x2a10   :  { %1981 = vrot.lane.b32.xlu0 %v2495_v54, %s2509_s3 }
0x2a82   :  { %v1982_v55 = vpop.permute.xlu0 %1981 }
0x2a83   :  { %v1984_v56 = vmul.f32 %v2493_v49, %v1982_v55 }
0x2a85   :  { %1986 = vrot.lane.b32.xlu1 %v1984_v56, %s2514_s1 }
0x2af7   :  { %v1987_v57 = vpop.permute.xlu1 %1986 }
0x2af8   :  { %2146 = vst.msk [vmem:[%s2830_s11 + $0xc] sm:$0x3] %vm1359_vm10, %v1987_v57  ;;  %2325 = vmatmul.mubr.msk.f32.vlgmr.msra.gmra.mrb[18].mxu1 %vm1081_vm8, %v1987_v57 }
0x2bcb   :  { %v2061_v59 = vpop.f32.mrb[18].mxu1 }
0x2bcc   :  { %v2065_v60 = vadd.f32 %v2061_v59, %v1992_v58  ;;  %v2326_v61 = vpop.f32.mrb[19].mxu1 }
0x2bce   :  { %2496 = vtanh.f32 %v2065_v60  ;;  %v2148_v63 = vmul.f32 -1.442695, %v2065_v60 }
0x2bd0   :  { %2498 = vpow2.f32 %v2148_v63 }
0x2bd8   :  { %v2497_v62 = vpop.eup %2496 }
0x2bd9   :  { %2075 = vrot.lane.b32.xlu0 %v2497_v62, %s2512_s7 }
0x2bda   :  { %v2499_v0 = vpop.eup %2498 }
0x2bdb   :  { %v2069_v1 = vadd.f32 1.0, %v2499_v0 }
0x2bdd   :  { %2500 = vrcp.f32 %v2069_v1 }
0x2be7   :  { %v2501_v3 = vpop.eup %2500 }
0x2be8   :  { %v2073_v7 = vmul.f32 %v2501_v3, %v1978_v8 }
0x2c4b   :  { %v2076_v4 = vpop.permute.xlu0 %2075 }
0x2c4c   :  { %v2078_v5 = vmul.f32 %v2501_v3, %v2076_v4 }
0x2c4e   :  { %2080 = vrot.lane.b32.xlu1 %v2078_v5, %s2513_s10 }
0x2cc0   :  { %v2081_v9 = vpop.permute.xlu1 %2080 }
0x2cc1   :  { %v2083_v10 = vadd.f32 %v2081_v9, %v2073_v7 }
0x2cc3   :  { %2502 = vtanh.f32 %v2083_v10 }
0x2ccd   :  { %v2503_v11 = vpop.eup %2502 }
0x2cce   :  { %2086 = vrot.lane.b32.xlu0 %v2503_v11, %s2509_s3 }
0x2d40   :  { %v2087_v12 = vpop.permute.xlu0 %2086 }
0x2d41   :  { %v2089_v13 = vmul.f32 %v2501_v3, %v2087_v12 }
0x2d43   :  { %2091 = vrot.lane.b32.xlu1 %v2089_v13, %s2514_s1 }
0x2db5   :  { %v2092_v14 = vpop.permute.xlu1 %2091 }
0x2db6   :  { %2149 = vst.msk [vmem:[%s2830_s11 + $0xe] sm:$0x3] %vm1359_vm10, %v2092_v14 }

</bundles_post_ra>
